<compile_context>
chip_gen: v5e
topology: v5e:2x2
jax: 0.10.0
libtpu: 0.0.40
codegen_flags: <defaults>
</compile_context>

<pallas_src>
import functools

import jax
import jax.numpy as jnp
from jax import lax
from jax.experimental import pallas as pl
from jax.experimental.pallas import tpu as pltpu


def _round_up(x, m):
    return (x + m - 1) // m * m


# One-hot MXU gather is only used when the padded table stays small in VMEM.
_FUSED_GATHER_MAX_VP = 4096


def _num_tensorcores():
    """Best-effort TensorCores-per-chip (2 on v7x, 1 on v5e/v6e). Safe fallback=1."""
    try:
        info = pltpu.get_tpu_info()
        for name in ("num_cores", "core_count", "num_tensorcores", "cores_per_chip"):
            n = getattr(info, name, None)
            if isinstance(n, int) and n > 0:
                return n
    except Exception:
        pass
    try:
        n = getattr(jax.devices()[0], "num_cores", None)
        if isinstance(n, int) and n > 0:
            return n
    except Exception:
        pass
    return 1


def _project_and_head(l_idx, c, ctx_e, cen_e, keep,
                      wx_ref, wc_ref, bf_ref, wuv_ref, buv_ref, out_ref):
    # ctx_e : (tb*C, Dp) bf16   gathered context embeddings
    # cen_e : (tb,   Dp) bf16   gathered center embeddings
    # keep  : (tb, C)    f32    1.0 where the context token is kept, 0.0 where padding
    tb = cen_e.shape[0]
    hp = wx_ref.shape[1]

    # Context half of f: one MXU pass over all tb*C rows (fills the M dimension).
    h_ctx = jnp.dot(ctx_e, wx_ref[...], preferred_element_type=jnp.float32)   # (tb*C, Hp)
    # Center half of f: computed once per batch row, broadcast over C below.
    h_cen = jnp.dot(cen_e, wc_ref[...], preferred_element_type=jnp.float32) + bf_ref[...]

    h_ctx3 = h_ctx.reshape(tb, c, hp)
    # Statically-unrolled masked accumulation over context positions: never
    # materializes the full (tb, C, Hp) f32 h_reps tensor (bounds vreg pressure).
    h = jnp.zeros((tb, hp), jnp.float32)
    for ci in range(c):
        hr = jnp.maximum(h_ctx3[:, ci, :] + h_cen, 0.0)
        h = h + jnp.where(keep[:, ci:ci + 1] > 0.0, hr, 0.0)

    # Fused u/v projection (lane-dense 128-wide output); exp only on the var column.
    lin = jnp.dot(h.astype(jnp.bfloat16), wuv_ref[...],
                  preferred_element_type=jnp.float32) + buv_ref[...]          # (tb, Np)
    col = lax.broadcasted_iota(jnp.int32, lin.shape, 1)
    out_ref[...] = jnp.where(col == l_idx, jnp.exp(lin), lin)


def _encoder_fused_kernel(l_idx, c, cen_ids_ref, ctx_ids_ref, keep_ref, emb_ref,
                          wx_ref, wc_ref, bf_ref, wuv_ref, buv_ref, out_ref):
    # Fused embedding gather: one_hot(ids) @ emb on the MXU (exact for a one-hot).
    tb = keep_ref.shape[0]
    vp = emb_ref.shape[0]
    emb = emb_ref[...]                                                        # (Vp, Dp) bf16
    cen_eq = cen_ids_ref[...] == lax.broadcasted_iota(jnp.int32, (tb, vp), 1)
    ctx_eq = ctx_ids_ref[...] == lax.broadcasted_iota(jnp.int32, (tb * c, vp), 1)
    cen_oh = jnp.where(cen_eq, 1.0, 0.0).astype(jnp.bfloat16)
    ctx_oh = jnp.where(ctx_eq, 1.0, 0.0).astype(jnp.bfloat16)
    cen_e = jnp.dot(cen_oh, emb, preferred_element_type=jnp.float32).astype(jnp.bfloat16)
    ctx_e = jnp.dot(ctx_oh, emb, preferred_element_type=jnp.float32).astype(jnp.bfloat16)
    _project_and_head(l_idx, c, ctx_e, cen_e, keep_ref[...],
                      wx_ref, wc_ref, bf_ref, wuv_ref, buv_ref, out_ref)


def _encoder_pregathered_kernel(l_idx, c, ctx_ref, cen_ref, keep_ref,
                                wx_ref, wc_ref, bf_ref, wuv_ref, buv_ref, out_ref):
    _project_and_head(l_idx, c, ctx_ref[...], cen_ref[...], keep_ref[...],
                      wx_ref, wc_ref, bf_ref, wuv_ref, buv_ref, out_ref)


def pack_params(params):
    """Pad + pack weights and the embedding table ONCE; reuse across forward calls."""
    emb = params["emb"]                      # (V, D) f32, row 0 is the zeroed padding row
    wf = params["wf"]                        # (2D, H); merged input = [center | context]
    V, D = emb.shape
    H = wf.shape[1]
    L = params["wu"].shape[1]

    Dp = _round_up(D, 128)
    Hp = _round_up(H, 128)
    Np = _round_up(L + 1, 128)
    Vp = _round_up(V, 128)

    emb_p = jnp.zeros((Vp, Dp), jnp.bfloat16).at[:V, :D].set(emb.astype(jnp.bfloat16))
    wc_p = jnp.zeros((Dp, Hp), jnp.bfloat16).at[:D, :H].set(wf[:D].astype(jnp.bfloat16))
    wx_p = jnp.zeros((Dp, Hp), jnp.bfloat16).at[:D, :H].set(wf[D:].astype(jnp.bfloat16))
    bf_p = jnp.zeros((1, Hp), jnp.float32).at[0, :H].set(params["bf"])

    wuv = jnp.concatenate([params["wu"], params["wv"]], axis=1)               # (H, L+1)
    wuv_p = jnp.zeros((Hp, Np), jnp.bfloat16).at[:H, :L + 1].set(wuv.astype(jnp.bfloat16))
    buv = jnp.concatenate([params["bu"], params["bv"]], axis=0)               # (L+1,)
    buv_p = jnp.zeros((1, Np), jnp.float32).at[0, :L + 1].set(buv)

    return dict(emb_p=emb_p, wx_p=wx_p, wc_p=wc_p, bf_p=bf_p,
                wuv_p=wuv_p, buv_p=buv_p, dims=(V, D, H, L))


def encoder_forward(center_ids, context_ids, mask, packed, *, tile_b=None):
    V, D, H, L = packed["dims"]
    B, C = context_ids.shape
    Vp, Dp = packed["emb_p"].shape
    Hp = packed["wx_p"].shape[1]
    Np = packed["wuv_p"].shape[1]

    if tile_b is None:
        # 1 grid step on single-TC chips (v5e/v6e); 2 "parallel" steps on 2-TC
        # chips (v7x) so the batch shards across the megacore without paying
        # 4+ tiny-step pipeline overhead.  VMEM footprint is <1 MiB either way.
        if _num_tensorcores() >= 2 and B % 16 == 0:
            tile_b = B // 2
        else:
            tile_b = B
    assert B % tile_b == 0
    assert tile_b == B or tile_b % 8 == 0, "tile_b must be a multiple of 8"
    grid = (B // tile_b,)

    keep = 1.0 - mask.astype(jnp.float32)                       # (B, C), 1.0 = keep

    full2 = lambda i: (0, 0)
    weight_specs = [
        pl.BlockSpec((Dp, Hp), full2),       # wx (context half of f)
        pl.BlockSpec((Dp, Hp), full2),       # wc (center half of f)
        pl.BlockSpec((1, Hp), full2),        # bf
        pl.BlockSpec((Hp, Np), full2),       # [wu | wv] fused
        pl.BlockSpec((1, Np), full2),        # [bu | bv] fused
    ]
    weight_args = (packed["wx_p"], packed["wc_p"], packed["bf_p"],
                   packed["wuv_p"], packed["buv_p"])

    if Vp <= _FUSED_GATHER_MAX_VP:
        # Embedding gather fused into the kernel (one-hot MXU gather from the
        # once-padded bf16 table): no padded activation round trip through HBM.
        cen_ids2 = center_ids.reshape(B, 1).astype(jnp.int32)
        ctx_ids2 = context_ids.reshape(B * C, 1).astype(jnp.int32)
        kernel = functools.partial(_encoder_fused_kernel, L, C)
        in_specs = [
            pl.BlockSpec((tile_b, 1), lambda i: (i, 0)),         # center ids
            pl.BlockSpec((tile_b * C, 1), lambda i: (i, 0)),     # context ids (flat)
            pl.BlockSpec((tile_b, C), lambda i: (i, 0)),         # keep mask
            pl.BlockSpec((Vp, Dp), full2),                       # padded emb table
        ] + weight_specs
        args = (cen_ids2, ctx_ids2, keep, packed["emb_p"]) + weight_args
    else:
        # TODO(synk): large-vocab path keeps the row gather in XLA (from the cached
        # padded table); an in-kernel DMA gather would remove this HBM round trip.
        ctx_e = jnp.take(packed["emb_p"], context_ids.reshape(-1), axis=0)   # (B*C, Dp) bf16
        cen_e = jnp.take(packed["emb_p"], center_ids, axis=0)                # (B, Dp) bf16
        kernel = functools.partial(_encoder_pregathered_kernel, L, C)
        in_specs = [
            pl.BlockSpec((tile_b * C, Dp), lambda i: (i, 0)),    # context embeddings
            pl.BlockSpec((tile_b, Dp), lambda i: (i, 0)),        # center embeddings
            pl.BlockSpec((tile_b, C), lambda i: (i, 0)),         # keep mask
        ] + weight_specs
        args = (ctx_e, cen_e, keep) + weight_args

    out = pl.pallas_call(
        kernel,
        out_shape=jax.ShapeDtypeStruct((B, Np), jnp.float32),
        grid_spec=pltpu.PrefetchScalarGridSpec(
            num_scalar_prefetch=0,
            grid=grid,
            in_specs=in_specs,
            out_specs=pl.BlockSpec((tile_b, Np), lambda i: (i, 0)),
        ),
        compiler_params=pltpu.CompilerParams(
            dimension_semantics=("parallel",),
        ),
    )(*args)

    mu = out[:, :L]
    var = out[:, L:L + 1]                     # exp already applied in-kernel
    return mu, var


def make_params(key, vocab_size, D, H, L):
    ks = jax.random.split(key, 7)
    emb = 0.1 * jax.random.normal(ks[0], (vocab_size, D), jnp.float32)
    emb = emb.at[0].set(0.0)                  # padding_idx=0
    wf = 0.1 * jax.random.normal(ks[1], (2 * D, H), jnp.float32)
    bf = 0.1 * jax.random.normal(ks[2], (H,), jnp.float32)
    wu = 0.1 * jax.random.normal(ks[3], (H, L), jnp.float32)
    bu = 0.1 * jax.random.normal(ks[4], (L,), jnp.float32)
    wv = 0.1 * jax.random.normal(ks[5], (H, 1), jnp.float32)
    bv = 0.1 * jax.random.normal(ks[6], (1,), jnp.float32)
    return dict(emb=emb, wf=wf, bf=bf, wu=wu, bu=bu, wv=wv, bv=bv)


def reference_forward(center_ids, context_ids, mask, p):
    # pure-JAX f32 reference mirroring the torch code (dropout = identity in eval)
    center_e = p["emb"][center_ids]
    context_e = p["emb"][context_ids]
    center_tiled = jnp.broadcast_to(center_e[:, None, :], context_e.shape)
    merged = jnp.concatenate([center_tiled, context_e], axis=-1)
    h_reps = jax.nn.relu(merged @ p["wf"] + p["bf"])
    h_reps = jnp.where(mask[..., None], 0.0, h_reps)
    h = h_reps.sum(axis=1)
    return h @ p["wu"] + p["bu"], jnp.exp(h @ p["wv"] + p["bv"])


if __name__ == "__main__":
    # batch=32, context_window=4 -> C=8, encoder_input_dim=16,
    # encoder_hidden_dim=32, latent_dim=16, vocab=64
    B, C, D, H, L, V = 32, 8, 16, 32, 16, 64

    key = jax.random.PRNGKey(0)
    k_param, k_center, k_ctx, k_pad = jax.random.split(key, 4)

    params = make_params(k_param, V, D, H, L)
    packed = pack_params(params)              # pad/pack weights + emb table ONCE

    center_ids = jax.random.randint(k_center, (B,), 1, V, dtype=jnp.int32)
    context_ids = jax.random.randint(k_ctx, (B, C), 1, V, dtype=jnp.int32)
    # knock some context positions down to the padding index 0
    pad_positions = jax.random.bernoulli(k_pad, 0.3, (B, C))
    context_ids = jnp.where(pad_positions, 0, context_ids)
    mask = context_ids == 0                   # True where padding

    mu, var = encoder_forward(center_ids, context_ids, mask, packed)
    jax.block_until_ready((mu, var))

    mu_ref, var_ref = reference_forward(center_ids, context_ids, mask, params)
    assert mu.shape == (B, L) and var.shape == (B, 1)
    # bf16 MXU operands (incl. bf16 embedding table) -> loosened tolerance vs f32 ref
    assert jnp.allclose(mu, mu_ref, atol=2e-2, rtol=2e-2), float(jnp.max(jnp.abs(mu - mu_ref)))
    assert jnp.allclose(var, var_ref, atol=2e-2, rtol=2e-2), float(jnp.max(jnp.abs(var - var_ref)))

    print("KERNEL_OK")
</pallas_src>

<mosaic_0001>
module attributes {stable_mosaic.version = 11 : i64} {
  func.func @_encoder_fused_kernel(%arg0: i32, %arg1: memref<32x1xi32, #tpu.memory_space<vmem>>, %arg2: memref<256x1xi32, #tpu.memory_space<vmem>>, %arg3: memref<32x8xf32, #tpu.memory_space<vmem>>, %arg4: memref<128x128xbf16, #tpu.memory_space<vmem>>, %arg5: memref<128x128xbf16, #tpu.memory_space<vmem>>, %arg6: memref<128x128xbf16, #tpu.memory_space<vmem>>, %arg7: memref<1x128xf32, #tpu.memory_space<vmem>>, %arg8: memref<128x128xbf16, #tpu.memory_space<vmem>>, %arg9: memref<1x128xf32, #tpu.memory_space<vmem>>, %arg10: memref<32x128xf32, #tpu.memory_space<vmem>>) attributes {dimension_semantics = [#tpu.dimension_semantics<parallel>], iteration_bounds = array<i64: 1>, scalar_prefetch = 0 : i64, scratch_operands = 0 : i64, tpu.core_type = #tpu.core_type<tc>, window_params = [{transform_indices = @transform_0, window_bounds = array<i64: 32, 1>}, {transform_indices = @transform_1, window_bounds = array<i64: 256, 1>}, {transform_indices = @transform_2, window_bounds = array<i64: 32, 8>}, {pipeline_mode = #tpu.pipeline_mode<synchronous>, transform_indices = @transform_3, window_bounds = array<i64: 128, 128>}, {pipeline_mode = #tpu.pipeline_mode<synchronous>, transform_indices = @transform_4, window_bounds = array<i64: 128, 128>}, {pipeline_mode = #tpu.pipeline_mode<synchronous>, transform_indices = @transform_5, window_bounds = array<i64: 128, 128>}, {pipeline_mode = #tpu.pipeline_mode<synchronous>, transform_indices = @transform_6, window_bounds = array<i64: 1, 128>}, {pipeline_mode = #tpu.pipeline_mode<synchronous>, transform_indices = @transform_7, window_bounds = array<i64: 128, 128>}, {pipeline_mode = #tpu.pipeline_mode<synchronous>, transform_indices = @transform_8, window_bounds = array<i64: 1, 128>}, {transform_indices = @transform_9, window_bounds = array<i64: 32, 128>}]} {
    %c0 = arith.constant 0 : index
    %c0_0 = arith.constant 0 : index
    %0 = vector.load %arg4[%c0, %c0_0] : memref<128x128xbf16, #tpu.memory_space<vmem>>, vector<128x128xbf16>
    %c0_1 = arith.constant 0 : index
    %c0_2 = arith.constant 0 : index
    %1 = vector.load %arg1[%c0_1, %c0_2] : memref<32x1xi32, #tpu.memory_space<vmem>>, vector<32x1xi32>
    %2 = tpu.iota {dimensions = array<i32: 1>} : vector<32x128xi32>
    %3 = vector.broadcast %1 : vector<32x1xi32> to vector<32x128xi32>
    %4 = arith.cmpi eq, %3, %2 : vector<32x128xi32>
    %c0_3 = arith.constant 0 : index
    %c0_4 = arith.constant 0 : index
    %5 = vector.load %arg2[%c0_3, %c0_4] : memref<256x1xi32, #tpu.memory_space<vmem>>, vector<256x1xi32>
    %6 = tpu.iota {dimensions = array<i32: 1>} : vector<256x128xi32>
    %7 = vector.broadcast %5 : vector<256x1xi32> to vector<256x128xi32>
    %8 = arith.cmpi eq, %7, %6 : vector<256x128xi32>
    %cst = arith.constant 1.000000e+00 : f32
    %cst_5 = arith.constant 0.000000e+00 : f32
    %9 = vector.broadcast %cst : f32 to vector<32x128xf32>
    %10 = vector.broadcast %cst_5 : f32 to vector<32x128xf32>
    %11 = arith.select %4, %9, %10 : vector<32x128xi1>, vector<32x128xf32>
    %12 = arith.truncf %11 : vector<32x128xf32> to vector<32x128xbf16>
    %cst_6 = arith.constant 1.000000e+00 : f32
    %cst_7 = arith.constant 0.000000e+00 : f32
    %13 = vector.broadcast %cst_6 : f32 to vector<256x128xf32>
    %14 = vector.broadcast %cst_7 : f32 to vector<256x128xf32>
    %15 = arith.select %8, %13, %14 : vector<256x128xi1>, vector<256x128xf32>
    %16 = arith.truncf %15 : vector<256x128xf32> to vector<256x128xbf16>
    %cst_8 = arith.constant dense<0.000000e+00> : vector<32x128xf32>
    %17 = tpu.matmul %12, %0, %cst_8 {dimension_numbers = #tpu.dot_dimension_numbers<[1], [0], [0], [1], [0, 0, 1, 1], [], []>} : vector<32x128xbf16>, vector<128x128xbf16>, vector<32x128xf32> -> vector<32x128xf32>
    %18 = arith.truncf %17 : vector<32x128xf32> to vector<32x128xbf16>
    %cst_9 = arith.constant dense<0.000000e+00> : vector<256x128xf32>
    %19 = tpu.matmul %16, %0, %cst_9 {dimension_numbers = #tpu.dot_dimension_numbers<[1], [0], [0], [1], [0, 0, 1, 1], [], []>} : vector<256x128xbf16>, vector<128x128xbf16>, vector<256x128xf32> -> vector<256x128xf32>
    %20 = arith.truncf %19 : vector<256x128xf32> to vector<256x128xbf16>
    %c0_10 = arith.constant 0 : index
    %c0_11 = arith.constant 0 : index
    %21 = vector.load %arg3[%c0_10, %c0_11] : memref<32x8xf32, #tpu.memory_space<vmem>>, vector<32x8xf32>
    %c0_12 = arith.constant 0 : index
    %c0_13 = arith.constant 0 : index
    %22 = vector.load %arg5[%c0_12, %c0_13] : memref<128x128xbf16, #tpu.memory_space<vmem>>, vector<128x128xbf16>
    %cst_14 = arith.constant dense<0.000000e+00> : vector<256x128xf32>
    %23 = tpu.matmul %20, %22, %cst_14 {dimension_numbers = #tpu.dot_dimension_numbers<[1], [0], [0], [1], [0, 0, 1, 1], [], []>} : vector<256x128xbf16>, vector<128x128xbf16>, vector<256x128xf32> -> vector<256x128xf32>
    %c0_15 = arith.constant 0 : index
    %c0_16 = arith.constant 0 : index
    %24 = vector.load %arg6[%c0_15, %c0_16] : memref<128x128xbf16, #tpu.memory_space<vmem>>, vector<128x128xbf16>
    %cst_17 = arith.constant dense<0.000000e+00> : vector<32x128xf32>
    %25 = tpu.matmul %18, %24, %cst_17 {dimension_numbers = #tpu.dot_dimension_numbers<[1], [0], [0], [1], [0, 0, 1, 1], [], []>} : vector<32x128xbf16>, vector<128x128xbf16>, vector<32x128xf32> -> vector<32x128xf32>
    %c0_18 = arith.constant 0 : index
    %c0_19 = arith.constant 0 : index
    %26 = vector.load %arg7[%c0_18, %c0_19] : memref<1x128xf32, #tpu.memory_space<vmem>>, vector<1x128xf32>
    %27 = vector.broadcast %26 : vector<1x128xf32> to vector<32x128xf32>
    %28 = arith.addf %25, %27 : vector<32x128xf32>
    %29 = vector.shape_cast %23 : vector<256x128xf32> to vector<32x8x128xf32>
    %cst_20 = arith.constant 0.000000e+00 : f32
    %30 = vector.broadcast %cst_20 : f32 to vector<32x128xf32>
    %31 = vector.extract_strided_slice %29 {offsets = [0, 0, 0], sizes = [32, 1, 128], strides = [1, 1, 1]} : vector<32x8x128xf32> to vector<32x1x128xf32>
    %32 = vector.shape_cast %31 : vector<32x1x128xf32> to vector<32x128xf32>
    %33 = arith.addf %32, %28 : vector<32x128xf32>
    %cst_21 = arith.constant 0.000000e+00 : f32
    %34 = vector.broadcast %cst_21 : f32 to vector<32x128xf32>
    %35 = arith.maximumf %33, %34 : vector<32x128xf32>
    %36 = vector.extract_strided_slice %21 {offsets = [0, 0], sizes = [32, 1], strides = [1, 1]} : vector<32x8xf32> to vector<32x1xf32>
    %cst_22 = arith.constant 0.000000e+00 : f32
    %37 = vector.broadcast %cst_22 : f32 to vector<32x1xf32>
    %38 = arith.cmpf ogt, %36, %37 : vector<32x1xf32>
    %cst_23 = arith.constant 0.000000e+00 : f32
    %39 = vector.shape_cast %38 : vector<32x1xi1> to vector<32x1xi1>
    %40 = vector.broadcast %39 : vector<32x1xi1> to vector<32x128xi1>
    %41 = vector.broadcast %cst_23 : f32 to vector<32x128xf32>
    %42 = arith.select %40, %35, %41 : vector<32x128xi1>, vector<32x128xf32>
    %43 = arith.addf %30, %42 : vector<32x128xf32>
    %44 = vector.extract_strided_slice %29 {offsets = [0, 1, 0], sizes = [32, 1, 128], strides = [1, 1, 1]} : vector<32x8x128xf32> to vector<32x1x128xf32>
    %45 = vector.shape_cast %44 : vector<32x1x128xf32> to vector<32x128xf32>
    %46 = arith.addf %45, %28 : vector<32x128xf32>
    %cst_24 = arith.constant 0.000000e+00 : f32
    %47 = vector.broadcast %cst_24 : f32 to vector<32x128xf32>
    %48 = arith.maximumf %46, %47 : vector<32x128xf32>
    %49 = vector.extract_strided_slice %21 {offsets = [0, 1], sizes = [32, 1], strides = [1, 1]} : vector<32x8xf32> to vector<32x1xf32>
    %cst_25 = arith.constant 0.000000e+00 : f32
    %50 = vector.broadcast %cst_25 : f32 to vector<32x1xf32>
    %51 = arith.cmpf ogt, %49, %50 : vector<32x1xf32>
    %cst_26 = arith.constant 0.000000e+00 : f32
    %52 = vector.shape_cast %51 : vector<32x1xi1> to vector<32x1xi1>
    %53 = vector.broadcast %52 : vector<32x1xi1> to vector<32x128xi1>
    %54 = vector.broadcast %cst_26 : f32 to vector<32x128xf32>
    %55 = arith.select %53, %48, %54 : vector<32x128xi1>, vector<32x128xf32>
    %56 = arith.addf %43, %55 : vector<32x128xf32>
    %57 = vector.extract_strided_slice %29 {offsets = [0, 2, 0], sizes = [32, 1, 128], strides = [1, 1, 1]} : vector<32x8x128xf32> to vector<32x1x128xf32>
    %58 = vector.shape_cast %57 : vector<32x1x128xf32> to vector<32x128xf32>
    %59 = arith.addf %58, %28 : vector<32x128xf32>
    %cst_27 = arith.constant 0.000000e+00 : f32
    %60 = vector.broadcast %cst_27 : f32 to vector<32x128xf32>
    %61 = arith.maximumf %59, %60 : vector<32x128xf32>
    %62 = vector.extract_strided_slice %21 {offsets = [0, 2], sizes = [32, 1], strides = [1, 1]} : vector<32x8xf32> to vector<32x1xf32>
    %cst_28 = arith.constant 0.000000e+00 : f32
    %63 = vector.broadcast %cst_28 : f32 to vector<32x1xf32>
    %64 = arith.cmpf ogt, %62, %63 : vector<32x1xf32>
    %cst_29 = arith.constant 0.000000e+00 : f32
    %65 = vector.shape_cast %64 : vector<32x1xi1> to vector<32x1xi1>
    %66 = vector.broadcast %65 : vector<32x1xi1> to vector<32x128xi1>
    %67 = vector.broadcast %cst_29 : f32 to vector<32x128xf32>
    %68 = arith.select %66, %61, %67 : vector<32x128xi1>, vector<32x128xf32>
    %69 = arith.addf %56, %68 : vector<32x128xf32>
    %70 = vector.extract_strided_slice %29 {offsets = [0, 3, 0], sizes = [32, 1, 128], strides = [1, 1, 1]} : vector<32x8x128xf32> to vector<32x1x128xf32>
    %71 = vector.shape_cast %70 : vector<32x1x128xf32> to vector<32x128xf32>
    %72 = arith.addf %71, %28 : vector<32x128xf32>
    %cst_30 = arith.constant 0.000000e+00 : f32
    %73 = vector.broadcast %cst_30 : f32 to vector<32x128xf32>
    %74 = arith.maximumf %72, %73 : vector<32x128xf32>
    %75 = vector.extract_strided_slice %21 {offsets = [0, 3], sizes = [32, 1], strides = [1, 1]} : vector<32x8xf32> to vector<32x1xf32>
    %cst_31 = arith.constant 0.000000e+00 : f32
    %76 = vector.broadcast %cst_31 : f32 to vector<32x1xf32>
    %77 = arith.cmpf ogt, %75, %76 : vector<32x1xf32>
    %cst_32 = arith.constant 0.000000e+00 : f32
    %78 = vector.shape_cast %77 : vector<32x1xi1> to vector<32x1xi1>
    %79 = vector.broadcast %78 : vector<32x1xi1> to vector<32x128xi1>
    %80 = vector.broadcast %cst_32 : f32 to vector<32x128xf32>
    %81 = arith.select %79, %74, %80 : vector<32x128xi1>, vector<32x128xf32>
    %82 = arith.addf %69, %81 : vector<32x128xf32>
    %83 = vector.extract_strided_slice %29 {offsets = [0, 4, 0], sizes = [32, 1, 128], strides = [1, 1, 1]} : vector<32x8x128xf32> to vector<32x1x128xf32>
    %84 = vector.shape_cast %83 : vector<32x1x128xf32> to vector<32x128xf32>
    %85 = arith.addf %84, %28 : vector<32x128xf32>
    %cst_33 = arith.constant 0.000000e+00 : f32
    %86 = vector.broadcast %cst_33 : f32 to vector<32x128xf32>
    %87 = arith.maximumf %85, %86 : vector<32x128xf32>
    %88 = vector.extract_strided_slice %21 {offsets = [0, 4], sizes = [32, 1], strides = [1, 1]} : vector<32x8xf32> to vector<32x1xf32>
    %cst_34 = arith.constant 0.000000e+00 : f32
    %89 = vector.broadcast %cst_34 : f32 to vector<32x1xf32>
    %90 = arith.cmpf ogt, %88, %89 : vector<32x1xf32>
    %cst_35 = arith.constant 0.000000e+00 : f32
    %91 = vector.shape_cast %90 : vector<32x1xi1> to vector<32x1xi1>
    %92 = vector.broadcast %91 : vector<32x1xi1> to vector<32x128xi1>
    %93 = vector.broadcast %cst_35 : f32 to vector<32x128xf32>
    %94 = arith.select %92, %87, %93 : vector<32x128xi1>, vector<32x128xf32>
    %95 = arith.addf %82, %94 : vector<32x128xf32>
    %96 = vector.extract_strided_slice %29 {offsets = [0, 5, 0], sizes = [32, 1, 128], strides = [1, 1, 1]} : vector<32x8x128xf32> to vector<32x1x128xf32>
    %97 = vector.shape_cast %96 : vector<32x1x128xf32> to vector<32x128xf32>
    %98 = arith.addf %97, %28 : vector<32x128xf32>
    %cst_36 = arith.constant 0.000000e+00 : f32
    %99 = vector.broadcast %cst_36 : f32 to vector<32x128xf32>
    %100 = arith.maximumf %98, %99 : vector<32x128xf32>
    %101 = vector.extract_strided_slice %21 {offsets = [0, 5], sizes = [32, 1], strides = [1, 1]} : vector<32x8xf32> to vector<32x1xf32>
    %cst_37 = arith.constant 0.000000e+00 : f32
    %102 = vector.broadcast %cst_37 : f32 to vector<32x1xf32>
    %103 = arith.cmpf ogt, %101, %102 : vector<32x1xf32>
    %cst_38 = arith.constant 0.000000e+00 : f32
    %104 = vector.shape_cast %103 : vector<32x1xi1> to vector<32x1xi1>
    %105 = vector.broadcast %104 : vector<32x1xi1> to vector<32x128xi1>
    %106 = vector.broadcast %cst_38 : f32 to vector<32x128xf32>
    %107 = arith.select %105, %100, %106 : vector<32x128xi1>, vector<32x128xf32>
    %108 = arith.addf %95, %107 : vector<32x128xf32>
    %109 = vector.extract_strided_slice %29 {offsets = [0, 6, 0], sizes = [32, 1, 128], strides = [1, 1, 1]} : vector<32x8x128xf32> to vector<32x1x128xf32>
    %110 = vector.shape_cast %109 : vector<32x1x128xf32> to vector<32x128xf32>
    %111 = arith.addf %110, %28 : vector<32x128xf32>
    %cst_39 = arith.constant 0.000000e+00 : f32
    %112 = vector.broadcast %cst_39 : f32 to vector<32x128xf32>
    %113 = arith.maximumf %111, %112 : vector<32x128xf32>
    %114 = vector.extract_strided_slice %21 {offsets = [0, 6], sizes = [32, 1], strides = [1, 1]} : vector<32x8xf32> to vector<32x1xf32>
    %cst_40 = arith.constant 0.000000e+00 : f32
    %115 = vector.broadcast %cst_40 : f32 to vector<32x1xf32>
    %116 = arith.cmpf ogt, %114, %115 : vector<32x1xf32>
    %cst_41 = arith.constant 0.000000e+00 : f32
    %117 = vector.shape_cast %116 : vector<32x1xi1> to vector<32x1xi1>
    %118 = vector.broadcast %117 : vector<32x1xi1> to vector<32x128xi1>
    %119 = vector.broadcast %cst_41 : f32 to vector<32x128xf32>
    %120 = arith.select %118, %113, %119 : vector<32x128xi1>, vector<32x128xf32>
    %121 = arith.addf %108, %120 : vector<32x128xf32>
    %122 = vector.extract_strided_slice %29 {offsets = [0, 7, 0], sizes = [32, 1, 128], strides = [1, 1, 1]} : vector<32x8x128xf32> to vector<32x1x128xf32>
    %123 = vector.shape_cast %122 : vector<32x1x128xf32> to vector<32x128xf32>
    %124 = arith.addf %123, %28 : vector<32x128xf32>
    %cst_42 = arith.constant 0.000000e+00 : f32
    %125 = vector.broadcast %cst_42 : f32 to vector<32x128xf32>
    %126 = arith.maximumf %124, %125 : vector<32x128xf32>
    %127 = vector.extract_strided_slice %21 {offsets = [0, 7], sizes = [32, 1], strides = [1, 1]} : vector<32x8xf32> to vector<32x1xf32>
    %cst_43 = arith.constant 0.000000e+00 : f32
    %128 = vector.broadcast %cst_43 : f32 to vector<32x1xf32>
    %129 = arith.cmpf ogt, %127, %128 : vector<32x1xf32>
    %cst_44 = arith.constant 0.000000e+00 : f32
    %130 = vector.shape_cast %129 : vector<32x1xi1> to vector<32x1xi1>
    %131 = vector.broadcast %130 : vector<32x1xi1> to vector<32x128xi1>
    %132 = vector.broadcast %cst_44 : f32 to vector<32x128xf32>
    %133 = arith.select %131, %126, %132 : vector<32x128xi1>, vector<32x128xf32>
    %134 = arith.addf %121, %133 : vector<32x128xf32>
    %135 = arith.truncf %134 : vector<32x128xf32> to vector<32x128xbf16>
    %c0_45 = arith.constant 0 : index
    %c0_46 = arith.constant 0 : index
    %136 = vector.load %arg8[%c0_45, %c0_46] : memref<128x128xbf16, #tpu.memory_space<vmem>>, vector<128x128xbf16>
    %cst_47 = arith.constant dense<0.000000e+00> : vector<32x128xf32>
    %137 = tpu.matmul %135, %136, %cst_47 {dimension_numbers = #tpu.dot_dimension_numbers<[1], [0], [0], [1], [0, 0, 1, 1], [], []>} : vector<32x128xbf16>, vector<128x128xbf16>, vector<32x128xf32> -> vector<32x128xf32>
    %c0_48 = arith.constant 0 : index
    %c0_49 = arith.constant 0 : index
    %138 = vector.load %arg9[%c0_48, %c0_49] : memref<1x128xf32, #tpu.memory_space<vmem>>, vector<1x128xf32>
    %139 = vector.broadcast %138 : vector<1x128xf32> to vector<32x128xf32>
    %140 = arith.addf %137, %139 : vector<32x128xf32>
    %141 = tpu.iota {dimensions = array<i32: 1>} : vector<32x128xi32>
    %c16_i32 = arith.constant 16 : i32
    %142 = vector.broadcast %c16_i32 : i32 to vector<32x128xi32>
    %143 = arith.cmpi eq, %141, %142 : vector<32x128xi32>
    %144 = math.exp %140 : vector<32x128xf32>
    %145 = arith.select %143, %144, %140 : vector<32x128xi1>, vector<32x128xf32>
    %c0_50 = arith.constant 0 : index
    %c0_51 = arith.constant 0 : index
    %146 = vector.load %arg10[%c0_50, %c0_51] : memref<32x128xf32, #tpu.memory_space<vmem>>, vector<32x128xf32>
    tpu.vector_store %arg10[%c0_50, %c0_51], %145 {strides = array<i32>} : memref<32x128xf32, #tpu.memory_space<vmem>>, vector<32x128xf32>,
    return
  }
  func.func @transform_0(%arg0: i32) -> (i32, i32) {
    %c0_i32 = arith.constant 0 : i32
    %c0_i32_0 = arith.constant 0 : i32
    return %arg0, %c0_i32 : i32, i32
  }
  func.func @transform_1(%arg0: i32) -> (i32, i32) {
    %c0_i32 = arith.constant 0 : i32
    %c0_i32_0 = arith.constant 0 : i32
    return %arg0, %c0_i32 : i32, i32
  }
  func.func @transform_2(%arg0: i32) -> (i32, i32) {
    %c0_i32 = arith.constant 0 : i32
    %c0_i32_0 = arith.constant 0 : i32
    return %arg0, %c0_i32 : i32, i32
  }
  func.func @transform_3(%arg0: i32) -> (i32, i32) {
    %c0_i32 = arith.constant 0 : i32
    %c0_i32_0 = arith.constant 0 : i32
    %c0_i32_1 = arith.constant 0 : i32
    return %c0_i32, %c0_i32_0 : i32, i32
  }
  func.func @transform_4(%arg0: i32) -> (i32, i32) {
    %c0_i32 = arith.constant 0 : i32
    %c0_i32_0 = arith.constant 0 : i32
    %c0_i32_1 = arith.constant 0 : i32
    return %c0_i32, %c0_i32_0 : i32, i32
  }
  func.func @transform_5(%arg0: i32) -> (i32, i32) {
    %c0_i32 = arith.constant 0 : i32
    %c0_i32_0 = arith.constant 0 : i32
    %c0_i32_1 = arith.constant 0 : i32
    return %c0_i32, %c0_i32_0 : i32, i32
  }
  func.func @transform_6(%arg0: i32) -> (i32, i32) {
    %c0_i32 = arith.constant 0 : i32
    %c0_i32_0 = arith.constant 0 : i32
    %c0_i32_1 = arith.constant 0 : i32
    return %c0_i32, %c0_i32_0 : i32, i32
  }
  func.func @transform_7(%arg0: i32) -> (i32, i32) {
    %c0_i32 = arith.constant 0 : i32
    %c0_i32_0 = arith.constant 0 : i32
    %c0_i32_1 = arith.constant 0 : i32
    return %c0_i32, %c0_i32_0 : i32, i32
  }
  func.func @transform_8(%arg0: i32) -> (i32, i32) {
    %c0_i32 = arith.constant 0 : i32
    %c0_i32_0 = arith.constant 0 : i32
    %c0_i32_1 = arith.constant 0 : i32
    return %c0_i32, %c0_i32_0 : i32, i32
  }
  func.func @transform_9(%arg0: i32) -> (i32, i32) {
    %c0_i32 = arith.constant 0 : i32
    %c0_i32_0 = arith.constant 0 : i32
    return %arg0, %c0_i32 : i32, i32
  }
}

</mosaic_0001>

<bundles_post_ra>
// kernel: tpu_custom_call.1
= control target key start
LH: loop header
LB: loop body
LE: loop exit
PB: predicated region body
PF: predicated region fallthrough
CT: control target
= control target key end

     0   :  { %v2648_v3 = vmov 0   ;;  %s4387_s0 = inlined_call_operand.vmem [shape: s32[32,1], index: 0, kind: input, shape index: {}]   ;;  %s4388_s1 = inlined_call_operand.vmem [shape: s32[256,1], index: 1, kind: input, shape index: {}]   ;;  %s4389_s2 = inlined_call_operand.vmem [shape: f32[32,8], index: 2, kind: input, shape index: {}]   ;;  %s4390_s3 = inlined_call_operand.vmem [shape: bf16[128,128], index: 3, kind: input, shape index: {}]   ;;  %s4391_s4 = inlined_call_operand.vmem [shape: bf16[128,128], index: 4, kind: input, shape index: {}]   ;;  %s4392_s5 = inlined_call_operand.vmem [shape: bf16[128,128], index: 5, kind: input, shape index: {}]   ;;  %s4393_s6 = inlined_call_operand.vmem [shape: f32[1,128], index: 6, kind: input, shape index: {}]   ;;  %s4394_s7 = inlined_call_operand.vmem [shape: bf16[128,128], index: 7, kind: input, shape index: {}]   ;;  %s4395_s8 = inlined_call_operand.vmem [shape: f32[1,128], index: 8, kind: input, shape index: {}]   ;;  %s4396_s9 = inlined_call_operand.hbm [shape: f32[32,128], index: 9, kind: output, shape index: {}]  }
   0x1   :  { %v75_v0 = vld [vmem:[%s4388_s1 + $0x20] sm:$0xff]  ;;  %v73_v1 = vld [vmem:[%s4388_s1 + $0x10] sm:$0xff]  ;;  %2580 = vset.pattern.permute.xlu2 %v2648_v3  ;;  %2579 = vset.pattern.permute.xlu1 %v2648_v3 }
   0x2   :  { %v71_v2 = vld [vmem:[%s4388_s1] sm:$0xff]  ;;  %2578 = vset.pattern.permute.xlu0 %v2648_v3  ;;  %116 = vperm.xlu2 %2580, %v75_v0  }
   0x3   :  { %110 = vperm.xlu1 %2579, %v73_v1   ;;  %104 = vperm.xlu0 %2578, %v71_v2  }
   0x4   :  { %14 = vsyncpa [#allocation3], 0  ;;  %v76_v4 = vld [vmem:[%s4388_s1 + $0x28] sm:$0xff]  ;;  %v74_v5 = vld [vmem:[%s4388_s1 + $0x18] sm:$0xff]  ;;  %v53_v52 = vlaneseq  ;;  %v2649_v57 = vmov 1.0|1.0  }
   0x5   :  { %v72_v6 = vld [vmem:[%s4388_s1 + $0x8] sm:$0xff]  ;;  %v79_v7 = vld [vmem:[%s4388_s1 + $0x40] sm:$0xff]  ;;  %v78_v8 = vld [vmem:[%s4388_s1 + $0x38] sm:$0xff]  ;;  %v2654_v63 = vmov 5   ;;  %s2658_s21 = smov 128   ;;  %s2659_s22 = smov 8  }
   0x6   :  { %v77_v9 = vld [vmem:[%s4388_s1 + $0x30] sm:$0xff]  ;;  %v82_v10 = vld [vmem:[%s4388_s1 + $0x58] sm:$0xff]  ;;  %v80_v12 = vld [vmem:[%s4388_s1 + $0x48] sm:$0xff]  ;;  %v2854_v53 = vand.u32 127, %v53_v52 }
   0x7   :  { %v81_v11 = vld [vmem:[%s4388_s1 + $0x50] sm:$0xff]  ;;  %v84_v14 = vld [vmem:[%s4388_s1 + $0x68] sm:$0xff]  ;;  %v83_v15 = vld [vmem:[%s4388_s1 + $0x60] sm:$0xff] }
   0x8   :  { %v85_v13 = vld [vmem:[%s4388_s1 + $0x70] sm:$0xff]  ;;  %v88_v16 = vld [vmem:[%s4388_s1 + $0x88] sm:$0xff]  ;;  %v87_v17 = vld [vmem:[%s4388_s1 + $0x80] sm:$0xff]  ;;  %4431 = vst [vmem:[#allocation5_spill] sm:$0xff] %v2854_v53 }
   0x9   :  { %v86_v18 = vld [vmem:[%s4388_s1 + $0x78] sm:$0xff]  ;;  %v91_v19 = vld [vmem:[%s4388_s1 + $0xa0] sm:$0xff]  ;;  %v89_v21 = vld [vmem:[%s4388_s1 + $0x90] sm:$0xff] }
   0xa   :  { %119 = vperm.xlu2 %2580, %v76_v4   ;;  %v90_v20 = vld [vmem:[%s4388_s1 + $0x98] sm:$0xff]  ;;  %v93_v23 = vld [vmem:[%s4388_s1 + $0xb0] sm:$0xff]  ;;  %v92_v24 = vld [vmem:[%s4388_s1 + $0xa8] sm:$0xff] }
   0xb   :  { %113 = vperm.xlu1 %2579, %v74_v5   ;;  %107 = vperm.xlu0 %2578, %v72_v6   ;;  %v94_v22 = vld [vmem:[%s4388_s1 + $0xb8] sm:$0xff]  ;;  %v97_v26 = vld [vmem:[%s4388_s1 + $0xd0] sm:$0xff]  ;;  %v96_v27 = vld [vmem:[%s4388_s1 + $0xc8] sm:$0xff] }
   0xc   :  { %v2517_v25 = vld [vmem:[%s4390_s3 + $0x38] sm:$0xff]  ;;  %v95_v28 = vld [vmem:[%s4388_s1 + $0xc0] sm:$0xff]  ;;  %v2516_v29 = vld [vmem:[%s4390_s3 + $0x30] sm:$0xff] }
   0xd   :  { %354 = vmatpush.bf16.msra.mxu1 %v2517_v25  ;;  %2542 = vmatpush.bf16.msra.mxu3 %v2517_v25  ;;  %v2515_v30 = vld [vmem:[%s4390_s3 + $0x28] sm:$0xff]  ;;  %v98_v32 = vld [vmem:[%s4388_s1 + $0xd8] sm:$0xff]  ;;  %v49_v33 = vld [vmem:[%s4387_s0] sm:$0xff] }
   0xe   :  { %333 = vmatpush.bf16.msra.mxu0 %v2517_v25  ;;  %v50_v31 = vld [vmem:[%s4387_s0 + $0x8] sm:$0xff]  ;;  %v2514_v34 = vld [vmem:[%s4390_s3 + $0x20] sm:$0xff]  ;;  %v2513_v35 = vld [vmem:[%s4390_s3 + $0x18] sm:$0xff] }
   0xf   :  { %v51_v36 = vld [vmem:[%s4387_s0 + $0x10] sm:$0xff]  ;;  %v99_v37 = vld [vmem:[%s4388_s1 + $0xe0] sm:$0xff]  ;;  %v100_v38 = vld [vmem:[%s4388_s1 + $0xe8] sm:$0xff] }
  0x10   :  { %v2512_v39 = vld [vmem:[%s4390_s3 + $0x10] sm:$0xff]  ;;  %v2511_v40 = vld [vmem:[%s4390_s3 + $0x8] sm:$0xff]  ;;  %v102_v41 = vld [vmem:[%s4388_s1 + $0xf8] sm:$0xff] }
  0x11   :  { %355 = vmatpush.bf16.msra.mxu1 %v2516_v29  ;;  %2543 = vmatpush.bf16.msra.mxu3 %v2516_v29  ;;  %v52_v42 = vld [vmem:[%s4387_s0 + $0x18] sm:$0xff]  ;;  %v101_v43 = vld [vmem:[%s4388_s1 + $0xf0] sm:$0xff]  ;;  %v2510_v45 = vld [vmem:[%s4390_s3] sm:$0xff] }
  0x12   :  { %128 = vperm.xlu2 %2580, %v79_v7   ;;  %334 = vmatpush.bf16.msra.mxu0 %v2516_v29  ;;  %v462_v44 = vld [vmem:[%s4389_s2 + $0x18] sm:$0xff] }
  0x13   :  { %125 = vperm.xlu1 %2579, %v78_v8   ;;  %122 = vperm.xlu0 %2578, %v77_v9   ;;  %vm834_vm0 = vcmp.gt.f32.partialorder %v462_v44, 0.0  ;;  %v2521_v29 = vld [vmem:[%s4391_s4 + $0x18] sm:$0xff]  ;;  %v2656_v8 = vmov 7  }
  0x14   :  { %v2849_v46 = vsel %vm834_vm0, 1, %v2648_v3  ;;  %v2533_v44 = vld [vmem:[%s4392_s5 + $0x38] sm:$0xff] }
  0x15   :  { %356 = vmatpush.bf16.msra.mxu1 %v2515_v30  ;;  %2544 = vmatpush.bf16.msra.mxu3 %v2515_v30 }
  0x16   :  { %335 = vmatpush.bf16.msra.mxu0 %v2515_v30  ;;  %v2520_v30 = vld [vmem:[%s4391_s4 + $0x10] sm:$0xff] }
  0x19   :  { %357 = vmatpush.bf16.msra.mxu1 %v2514_v34  ;;  %2545 = vmatpush.bf16.msra.mxu3 %v2514_v34 }
  0x1a   :  { %137 = vperm.xlu2 %2580, %v82_v10   ;;  %336 = vmatpush.bf16.msra.mxu0 %v2514_v34  ;;  %v461_v34 = vld [vmem:[%s4389_s2 + $0x10] sm:$0xff] }
  0x1b   :  { %134 = vperm.xlu1 %2579, %v81_v11   ;;  %131 = vperm.xlu0 %2578, %v80_v12  }
  0x1d   :  { %358 = vmatpush.bf16.msra.mxu1 %v2513_v35  ;;  %2546 = vmatpush.bf16.msra.mxu3 %v2513_v35 }
  0x1e   :  { %337 = vmatpush.bf16.msra.mxu0 %v2513_v35  ;;  %v2650_v35 = vmov 2  }
  0x21   :  { %359 = vmatpush.bf16.msra.mxu1 %v2512_v39  ;;  %2547 = vmatpush.bf16.msra.mxu3 %v2512_v39 }
  0x22   :  { %146 = vperm.xlu2 %2580, %v85_v13   ;;  %338 = vmatpush.bf16.msra.mxu0 %v2512_v39 }
  0x23   :  { %143 = vperm.xlu1 %2579, %v84_v14   ;;  %140 = vperm.xlu0 %2578, %v83_v15  }
  0x25   :  { %360 = vmatpush.bf16.msra.mxu1 %v2511_v40  ;;  %2548 = vmatpush.bf16.msra.mxu3 %v2511_v40 }
  0x26   :  { %339 = vmatpush.bf16.msra.mxu0 %v2511_v40 }
  0x29   :  { %361 = vmatpush.bf16.msra.mxu1 %v2510_v45  ;;  %2549 = vmatpush.bf16.msra.mxu3 %v2510_v45 }
  0x2a   :  { %155 = vperm.xlu2 %2580, %v88_v16   ;;  %340 = vmatpush.bf16.msra.mxu0 %v2510_v45  ;;  %v460_v45 = vld [vmem:[%s4389_s2 + $0x8] sm:$0xff] }
  0x2b   :  { %152 = vperm.xlu1 %2579, %v87_v17   ;;  %149 = vperm.xlu0 %2578, %v86_v18  }
  0x2d   :  { %684 = vmatpush.bf16.msrb.mxu3 %v2533_v44 }
  0x32   :  { %164 = vperm.xlu2 %2580, %v91_v19  }
  0x33   :  { %161 = vperm.xlu1 %2579, %v90_v20   ;;  %158 = vperm.xlu0 %2578, %v89_v21  }
  0x3a   :  { %173 = vperm.xlu2 %2580, %v94_v22   ;;  %v2525_v22 = vld [vmem:[%s4391_s4 + $0x38] sm:$0xff] }
  0x3b   :  { %170 = vperm.xlu1 %2579, %v93_v23   ;;  %167 = vperm.xlu0 %2578, %v92_v24   ;;  %v2524_v23 = vld [vmem:[%s4391_s4 + $0x30] sm:$0xff] }
  0x3c   :  { %527 = vmatpush.bf16.msrb.mxu0 %v2525_v22  ;;  %2550 = vmatpush.bf16.msra.mxu2 %v2525_v22 }
  0x40   :  { %528 = vmatpush.bf16.msrb.mxu0 %v2524_v23  ;;  %2551 = vmatpush.bf16.msra.mxu2 %v2524_v23 }
  0x42   :  { %182 = vperm.xlu2 %2580, %v97_v26  }
  0x43   :  { %179 = vperm.xlu1 %2579, %v96_v27   ;;  %176 = vperm.xlu0 %2578, %v95_v28   ;;  %v2523_v27 = vld [vmem:[%s4391_s4 + $0x28] sm:$0xff]  ;;  %v2522_v28 = vld [vmem:[%s4391_s4 + $0x20] sm:$0xff] }
  0x44   :  { %529 = vmatpush.bf16.msrb.mxu0 %v2523_v27  ;;  %2552 = vmatpush.bf16.msra.mxu2 %v2523_v27 }
  0x48   :  { %530 = vmatpush.bf16.msrb.mxu0 %v2522_v28  ;;  %2553 = vmatpush.bf16.msra.mxu2 %v2522_v28 }
  0x4a   :  { %59 = vperm.xlu2 %2580, %v50_v31   ;;  %v2519_v31 = vld [vmem:[%s4391_s4 + $0x8] sm:$0xff] }
  0x4b   :  { %185 = vperm.xlu0 %2578, %v98_v32   ;;  %56 = vperm.xlu1 %2579, %v49_v33   ;;  %v2518_v32 = vld [vmem:[%s4391_s4] sm:$0xff] }
  0x4c   :  { %531 = vmatpush.bf16.msrb.mxu0 %v2521_v29  ;;  %2554 = vmatpush.bf16.msra.mxu2 %v2521_v29 }
  0x50   :  { %532 = vmatpush.bf16.msrb.mxu0 %v2520_v30  ;;  %2555 = vmatpush.bf16.msra.mxu2 %v2520_v30 }
  0x52   :  { %62 = vperm.xlu2 %2580, %v51_v36  }
  0x53   :  { %188 = vperm.xlu0 %2578, %v99_v37   ;;  %191 = vperm.xlu1 %2579, %v100_v38   ;;  %v2651_v37 = vmov 1  }
  0x54   :  { %533 = vmatpush.bf16.msrb.mxu0 %v2519_v31  ;;  %2556 = vmatpush.bf16.msra.mxu2 %v2519_v31 }
  0x58   :  { %534 = vmatpush.bf16.msrb.mxu0 %v2518_v32  ;;  %2557 = vmatpush.bf16.msra.mxu2 %v2518_v32 }
  0x5a   :  { %197 = vperm.xlu2 %2580, %v102_v41   ;;  %v2652_v41 = vmov 3  }
  0x5b   :  { %65 = vperm.xlu0 %2578, %v52_v42   ;;  %194 = vperm.xlu1 %2579, %v101_v43  }
  0x5c   :  { %v117_v47 = vpop.permute.xlu2 %116 }
  0x5d   :  { %vm203_vm13 = vcmp.eq.s32.totalorder %v117_v47, %v2854_v53 }
  0x62   :  { %2581 = vset.pattern.permute.xlu2 %v2651_v37 }
  0x63   :  { %849 = vperm.xlu1 %2579, %v2849_v46   ;;  %2582 = vset.pattern.permute.xlu0 %v2651_v37 }
  0x64   :  { %v120_v48 = vpop.permute.xlu2 %119  ;;  %1036 = vperm.xlu0 %2582, %v2849_v46  }
  0x65   :  { %vm204_vm14 = vcmp.eq.s32.totalorder %v120_v48, %v2854_v53  ;;  %v2532_v48 = vld [vmem:[%s4392_s5 + $0x30] sm:$0xff] }
  0x66   :  { %vm2386_vm15 = vmpackc.low %vm204_vm14, %vm203_vm13  ;;  %685 = vmatpush.bf16.msrb.mxu3 %v2532_v48 }
  0x6b   :  { %2584 = vset.pattern.permute.xlu1 %v2650_v35 }
  0x6c   :  { %v2852_v51 = vpop.permute.xlu2 %128  ;;  %2583 = vset.pattern.permute.xlu0 %v2648_v3 }
  0x74   :  { %v138_v56 = vpop.permute.xlu2 %137 }
  0x75   :  { %v111_v49 = vpop.permute.xlu1 %110  ;;  %v105_v50 = vpop.permute.xlu0 %104  ;;  %vm210_vm4 = vcmp.eq.s32.totalorder %v138_v56, %v2854_v53  ;;  %v2529_v56 = vld [vmem:[%s4392_s5 + $0x18] sm:$0xff] }
  0x76   :  { %vm199_vm2 = vcmp.eq.s32.totalorder %v105_v50, %v2854_v53  ;;  %vm201_vm5 = vcmp.eq.s32.totalorder %v111_v49, %v2854_v53  ;;  %v2531_v50 = vld [vmem:[%s4392_s5 + $0x28] sm:$0xff] }
  0x77   :  { %686 = vmatpush.bf16.msrb.mxu3 %v2531_v50 }
  0x7c   :  { %v147_v60 = vpop.permute.xlu2 %146 }
  0x7d   :  { %v114_v54 = vpop.permute.xlu1 %113  ;;  %v108_v55 = vpop.permute.xlu0 %107 }
  0x7e   :  { %vm200_vm1 = vcmp.eq.s32.totalorder %v108_v55, %v2854_v53  ;;  %vm202_vm6 = vcmp.eq.s32.totalorder %v114_v54, %v2854_v53  ;;  %v459_v55 = vld [vmem:[%s4389_s2] sm:$0xff]  ;;  %s2334_s2 = sshll.u32 %s4396_s9, 4  ;;  %s2335_s2 = int_to_ptr.hbm [resolvable:$true] %s2334_s2 }
  0x7f   :  { %vm2382_vm3 = vmpackc.low %vm200_vm1, %vm199_vm2 }
  0x80   :  { %2383 = vmatmul.msk.bf16.vlgmr.msra.gmra.mxu1 %vm2382_vm3, %v2649_v57  ;;  %vm2384_vm9 = vmpackc.low %vm202_vm6, %vm201_vm5  ;;  %vm213_vm3 = vcmp.eq.s32.totalorder %v147_v60, %v2854_v53  ;;  %v2653_v60 = vmov 4  }
  0x84   :  { %v156_v0 = vpop.permute.xlu2 %155 }
  0x85   :  { %v126_v58 = vpop.permute.xlu1 %125  ;;  %v123_v59 = vpop.permute.xlu0 %122  ;;  %vm216_vm0 = vcmp.eq.s32.totalorder %v156_v0, %v2854_v53 }
  0x8c   :  { %v165_v7 = vpop.permute.xlu2 %164 }
  0x8d   :  { %v135_v61 = vpop.permute.xlu1 %134  ;;  %v132_v62 = vpop.permute.xlu0 %131 }
  0x8e   :  { %vm209_vm7 = vcmp.eq.s32.totalorder %v135_v61, %v2854_v53  ;;  %v2526_v61 = vld [vmem:[%s4392_s5] sm:$0xff] }
  0x8f   :  { %vm2863_vm8 = vmpackc.low %vm210_vm4, %vm209_vm7 }
  0x90   :  { %2385 = vmatmul.msk.bf16.gmra.mxu1 %vm2384_vm9, %v2649_v57 }
  0x94   :  { %v174_v13 = vpop.permute.xlu2 %173 }
  0x95   :  { %v144_v1 = vpop.permute.xlu1 %143  ;;  %v141_v2 = vpop.permute.xlu0 %140 }
  0x96   :  { %vm212_vm10 = vcmp.eq.s32.totalorder %v144_v1, %v2854_v53  ;;  %vm211_vm11 = vcmp.eq.s32.totalorder %v141_v2, %v2854_v53 }
  0x97   :  { %vm2870_vm12 = vmpackc.low %vm212_vm10, %vm211_vm11  ;;  %vm206_vm10 = vcmp.eq.s32.totalorder %v126_v58, %v2854_v53  ;;  %vm205_vm11 = vcmp.eq.s32.totalorder %v123_v59, %v2854_v53  ;;  %v2528_v58 = vld [vmem:[%s4392_s5 + $0x10] sm:$0xff] }
  0x98   :  { %vm2388_vm14 = vmpackc.low %vm206_vm10, %vm205_vm11  ;;  %vm222_vm11 = vcmp.eq.s32.totalorder %v174_v13, %v2854_v53 }
  0x9c   :  { %v183_v16 = vpop.permute.xlu2 %182 }
  0x9d   :  { %v153_v5 = vpop.permute.xlu1 %152  ;;  %v150_v6 = vpop.permute.xlu0 %149 }
  0x9e   :  { %vm215_vm1 = vcmp.eq.s32.totalorder %v153_v5, %v2854_v53  ;;  %vm214_vm2 = vcmp.eq.s32.totalorder %v150_v6, %v2854_v53  ;;  %v2655_v5 = vmov 6  }
  0x9f   :  { %vm2880_vm4 = vmpackc.low %vm216_vm0, %vm215_vm1  ;;  %vm207_vm1 = vcmp.eq.s32.totalorder %v2852_v51, %v2854_v53  ;;  %v2530_v51 = vld [vmem:[%s4392_s5 + $0x20] sm:$0xff] }
  0xa0   :  { %vm2884_vm5 = vmpackc.low %vm214_vm2, %vm213_vm3  ;;  %2387 = vmatmul.msk.bf16.gmra.mxu1 %vm2386_vm15, %v2649_v57  ;;  %vm219_vm15 = vcmp.eq.s32.totalorder %v165_v7, %v2854_v53  ;;  %vm208_vm2 = vcmp.eq.s32.totalorder %v132_v62, %v2854_v53  ;;  %687 = vmatpush.bf16.msrb.mxu3 %v2530_v51 }
  0xa4   :  { %v60_v19 = vpop.permute.xlu2 %59  ;;  %688 = vmatpush.bf16.msrb.mxu3 %v2529_v56 }
  0xa5   :  { %v162_v10 = vpop.permute.xlu1 %161  ;;  %v159_v11 = vpop.permute.xlu0 %158  ;;  %vm68_vm10 = vcmp.eq.s32.totalorder %v60_v19, %v2854_v53 }
  0xa6   :  { %vm218_vm6 = vcmp.eq.s32.totalorder %v162_v10, %v2854_v53  ;;  %vm217_vm7 = vcmp.eq.s32.totalorder %v159_v11, %v2854_v53 }
  0xa7   :  { %vm2891_vm9 = vmpackc.low %vm218_vm6, %vm217_vm7 }
  0xa8   :  { %vm2390_vm7 = vmpackc.low %vm208_vm2, %vm207_vm1  ;;  %689 = vmatpush.bf16.msrb.mxu3 %v2528_v58 }
  0xac   :  { %v63_v25 = vpop.permute.xlu2 %62 }
  0xad   :  { %v171_v14 = vpop.permute.xlu1 %170  ;;  %v168_v15 = vpop.permute.xlu0 %167 }
  0xae   :  { %vm220_vm13 = vcmp.eq.s32.totalorder %v168_v15, %v2854_v53  ;;  %vm221_vm3 = vcmp.eq.s32.totalorder %v171_v14, %v2854_v53 }
  0xaf   :  { %vm2402_vm0 = vmpackc.low %vm220_vm13, %vm219_vm15  ;;  %vm69_vm15 = vcmp.eq.s32.totalorder %v63_v25, %v2854_v53 }
  0xb0   :  { %2389 = vmatmul.msk.bf16.gmra.mxu1 %vm2388_vm14, %v2649_v57  ;;  %2403 = vmatmul.msk.bf16.vlgmr.msra.gmra.mxu3 %vm2402_vm0, %v2649_v57  ;;  %vm2404_vm14 = vmpackc.low %vm222_vm11, %vm221_vm3 }
  0xb4   :  { %v198_v39 = vpop.permute.xlu2 %197 }
  0xb5   :  { %v180_v17 = vpop.permute.xlu1 %179  ;;  %v177_v18 = vpop.permute.xlu0 %176 }
  0xb6   :  { %vm224_vm0 = vcmp.eq.s32.totalorder %v180_v17, %v2854_v53  ;;  %vm223_vm1 = vcmp.eq.s32.totalorder %v177_v18, %v2854_v53 }
  0xbd   :  { %v186_v20 = vpop.permute.xlu0 %185  ;;  %v57_v21 = vpop.permute.xlu1 %56 }
  0xbe   :  { %vm67_vm6 = vcmp.eq.s32.totalorder %v57_v21, %v2854_v53 }
  0xbf   :  { %vm2378_vm13 = vmpackc.low %vm68_vm10, %vm67_vm6 }
  0xc0   :  { %2379 = vmatmul.msk.bf16.vlgmr.msra.gmra.mxu0 %vm2378_vm13, %v2649_v57  ;;  %2391 = vmatmul.msk.bf16.gmra.mxu1 %vm2390_vm7, %v2649_v57  ;;  %vm2406_vm6 = vmpackc.low %vm224_vm0, %vm223_vm1  ;;  %vm225_vm7 = vcmp.eq.s32.totalorder %v183_v16, %v2854_v53  ;;  %vm831_vm1 = vcmp.gt.f32.partialorder %v459_v55, 0.0 }
  0xc1   :  { %2405 = vmatmul.msk.bf16.gmra.mxu3 %vm2404_vm14, %v2649_v57  ;;  %vm833_vm14 = vcmp.gt.f32.partialorder %v461_v34, 0.0 }
  0xc2   :  { %v2961_v36 = vsel %vm833_vm14, 1, %v2648_v3 }
  0xc3   :  { %1213 = vperm.xlu1 %2584, %v2961_v36   ;;  %1033 = vperm.xlu2 %2581, %v2961_v36  }
  0xc4   :  { %846 = vperm.xlu0 %2583, %v2961_v36  }
  0xc5   :  { %v189_v24 = vpop.permute.xlu0 %188  ;;  %v192_v33 = vpop.permute.xlu1 %191 }
  0xc6   :  { %vm227_vm11 = vcmp.eq.s32.totalorder %v189_v24, %v2854_v53  ;;  %vm228_vm13 = vcmp.eq.s32.totalorder %v192_v33, %v2854_v53 }
  0xcb   :  { %2586 = vset.pattern.permute.xlu1 %v2652_v41  ;;  %2585 = vset.pattern.permute.xlu2 %v2650_v35 }
  0xcc   :  { %1393 = vperm.xlu1 %2586, %v2961_v36   ;;  %1216 = vperm.xlu2 %2585, %v2849_v46  }
  0xcd   :  { %v66_v26 = vpop.permute.xlu0 %65  ;;  %v195_v38 = vpop.permute.xlu1 %194 }
  0xce   :  { %vm70_vm2 = vcmp.eq.s32.totalorder %v66_v26, %v2854_v53 }
  0xcf   :  { %vm2380_vm3 = vmpackc.low %vm70_vm2, %vm69_vm15  ;;  %vm230_vm15 = vcmp.eq.s32.totalorder %v198_v39, %v2854_v53  ;;  %vm4430_vm2 = vcmask 1042434  }
  0xd0   :  { %2381 = vmatmul.msk.bf16.gmra.mxu0 %vm2380_vm3, %v2649_v57  ;;  %2393 = vmatmul.msk.bf16.gmra.mxu1 %vm2863_vm8, %v2649_v57  ;;  %vm226_vm8 = vcmp.eq.s32.totalorder %v186_v20, %v2854_v53  ;;  %vm894_vm3 = vcmask 1043459  }
  0xd1   :  { %2407 = vmatmul.msk.bf16.gmra.mxu3 %vm2406_vm6, %v2649_v57  ;;  %vm2408_vm10 = vmpackc.low %vm226_vm8, %vm225_vm7  ;;  %vm897_vm6 = vcmask 1044484   ;;  %vm900_vm8 = vcmask 1045509   ;;  %vm903_vm7 = vcmask 1046534  }
  0xd4   :  { %2588 = vset.pattern.permute.xlu1 %v2648_v3  ;;  %2587 = vset.pattern.permute.xlu2 %v2652_v41 }
  0xd5   :  { %1396 = vperm.xlu2 %2587, %v2849_v46  }
  0xdd   :  { %2589 = vset.pattern.permute.xlu2 %v2651_v37 }
  0xe0   :  { %2395 = vmatmul.msk.bf16.gmra.mxu1 %vm2870_vm12, %v2649_v57  ;;  %vm2410_vm12 = vmpackc.low %vm228_vm13, %vm227_vm11 }
  0xe1   :  { %2409 = vmatmul.msk.bf16.gmra.mxu3 %vm2408_vm10, %v2649_v57  ;;  %vm906_vm10 = vcmask 1047559  }
  0xf0   :  { %2397 = vmatmul.msk.bf16.gmra.mxu1 %vm2884_vm5, %v2649_v57  ;;  %vm229_vm5 = vcmp.eq.s32.totalorder %v195_v38, %v2854_v53 }
  0xf1   :  { %2411 = vmatmul.msk.bf16.gmra.mxu3 %vm2410_vm12, %v2649_v57  ;;  %vm2412_vm0 = vmpackc.low %vm230_vm15, %vm229_vm5 }
  0xfd   :  { %v363_v40 = vpop.f32.mrf.mxu1 }
 0x100   :  { %2399 = vmatmul.msk.bf16.gmra.mxu1 %vm2880_vm4, %v2649_v57  ;;  %vm832_vm4 = vcmp.gt.f32.partialorder %v460_v45, 0.0 }
 0x101   :  { %2413 = vmatmul.msk.bf16.gmra.mxu3 %vm2412_vm0, %v2649_v57  ;;  %v2986_v47 = vsel %vm832_vm4, 1, %v2648_v3 }
 0x102   :  { %843 = vperm.xlu1 %2588, %v2986_v47  }
 0x105   :  { %v365_v42 = vpop.f32.mrf.mxu1 }
 0x106   :  { %v443_v43 = vpack.c.bf16 %v365_v42, %v363_v40  ;;  %v3060_v42 = vpop.permute.xlu0 %1036 }
 0x107   :  { %4442 = vst [vmem:[#allocation6_spill] sm:$0xff] %v3060_v42 }
 0x108   :  { %535 = vmatmul.bf16.vlgmr.msrb.gmra.mxu0 %v443_v43 }
 0x10a   :  { %2590 = vset.pattern.permute.xlu1 %v2651_v37 }
 0x10b   :  { %1030 = vperm.xlu1 %2590, %v2986_v47  }
 0x10d   :  { %v368_v49 = vpop.f32.mrf.mxu1 }
 0x110   :  { %2401 = vmatmul.msk.bf16.gmra.mxu1 %vm2891_vm9, %v2649_v57  ;;  %v3011_v57 = vsel %vm831_vm1, 1, %v2648_v3  ;;  %v2527_v3 = vld [vmem:[%s4392_s5 + $0x8] sm:$0xff]  ;;  %vm4429_vm9 = vcmask 1041409  }
 0x111   :  { %1027 = vperm.xlu2 %2589, %v3011_v57   ;;  %840 = vperm.xlu0 %2583, %v3011_v57  }
 0x112   :  { %690 = vmatpush.bf16.msrb.mxu3 %v2527_v3 }
 0x113   :  { %2592 = vset.pattern.permute.xlu1 %v2650_v35 }
 0x114   :  { %1207 = vperm.xlu1 %2592, %v3011_v57  }
 0x115   :  { %v370_v52 = vpop.f32.mrf.mxu1 }
 0x116   :  { %v444_v54 = vpack.c.bf16 %v370_v52, %v368_v49  ;;  %691 = vmatpush.bf16.msrb.mxu3 %v2526_v61 }
 0x118   :  { %540 = vmatmul.bf16.gmra.mxu0 %v444_v54  ;;  %v3076_v54 = vpop.permute.xlu1 %849 }
 0x119   :  { %2591 = vset.pattern.permute.xlu2 %v2653_v60  ;;  %2596 = vset.pattern.permute.xlu0 %v2652_v41  ;;  %4444 = vst [vmem:[#allocation8_spill] sm:$0xff] %v3076_v54 }
 0x11a   :  { %1573 = vperm.xlu2 %2591, %v2961_v36   ;;  %1387 = vperm.xlu0 %2596, %v3011_v57  }
 0x11c   :  { %2594 = vset.pattern.permute.xlu1 %v2654_v63 }
 0x11d   :  { %v373_v59 = vpop.f32.mrf.mxu1  ;;  %1753 = vperm.xlu1 %2594, %v2961_v36   ;;  %v3080_v56 = vpop.permute.xlu2 %1033 }
 0x11e   :  { %4445 = vst [vmem:[#allocation9_spill] sm:$0xff] %v3080_v56 }
 0x122   :  { %2593 = vset.pattern.permute.xlu2 %v2650_v35  ;;  %2597 = vset.pattern.permute.xlu0 %v2653_v60 }
 0x123   :  { %1210 = vperm.xlu2 %2593, %v2986_v47   ;;  %1576 = vperm.xlu0 %2597, %v2849_v46  }
 0x125   :  { %v375_v62 = vpop.f32.mrf.mxu1  ;;  %2598 = vset.pattern.permute.xlu1 %v2652_v41 }
 0x126   :  { %v445_v0 = vpack.c.bf16 %v375_v62, %v373_v59  ;;  %1390 = vperm.xlu1 %2598, %v2986_v47   ;;  %v3092_v62 = vpop.permute.xlu2 %1216 }
 0x127   :  { %4448 = vst [vmem:[#allocation12_spill] sm:$0xff] %v3092_v62 }
 0x128   :  { %545 = vmatmul.bf16.gmra.mxu0 %v445_v0 }
 0x12b   :  { %2595 = vset.pattern.permute.xlu2 %v2654_v63  ;;  %1570 = vperm.xlu0 %2597, %v2986_v47  }
 0x12c   :  { %1756 = vperm.xlu2 %2595, %v2849_v46  }
 0x12d   :  { %v378_v1 = vpop.f32.mrf.mxu1 }
 0x12e   :  { %2600 = vset.pattern.permute.xlu1 %v2655_v5 }
 0x12f   :  { %1936 = vperm.xlu1 %2600, %v2849_v46  }
 0x133   :  { %2606 = vset.pattern.permute.xlu0 %v2655_v5  ;;  %v413_v15 = vpop.f32.mrf.mxu3 }
 0x134   :  { %2599 = vset.pattern.permute.xlu2 %v2655_v5  ;;  %1927 = vperm.xlu0 %2606, %v3011_v57  }
 0x135   :  { %v380_v2 = vpop.f32.mrf.mxu1  ;;  %1933 = vperm.xlu2 %2599, %v2961_v36   ;;  %v3086_v59 = vpop.permute.xlu1 %1213 }
 0x136   :  { %v446_v4 = vpack.c.bf16 %v380_v2, %v378_v1  ;;  %4446 = vst [vmem:[#allocation10_spill] sm:$0xff] %v3086_v59 }
 0x137   :  { %2602 = vset.pattern.permute.xlu1 %v2656_v8 }
 0x138   :  { %550 = vmatmul.bf16.gmra.mxu0 %v446_v4  ;;  %2113 = vperm.xlu1 %2602, %v2961_v36  }
 0x13b   :  { %v415_v21 = vpop.f32.mrf.mxu3 }
 0x13c   :  { %2610 = vset.pattern.permute.xlu0 %v2656_v8  ;;  %v453_v45 = vpack.c.bf16 %v415_v21, %v413_v15 }
 0x13d   :  { %v342_v6 = vpop.f32.mrf.mxu0  ;;  %v383_v7 = vpop.f32.mrf.mxu1  ;;  %2601 = vset.pattern.permute.xlu2 %v2653_v60 }
 0x13e   :  { %1567 = vperm.xlu2 %2601, %v3011_v57   ;;  %v3099_v1 = vpop.permute.xlu1 %1393 }
 0x13f   :  { %4450 = vst [vmem:[#allocation14_spill] sm:$0xff] %v3099_v1 }
 0x140   :  { %2604 = vset.pattern.permute.xlu1 %v2654_v63 }
 0x141   :  { %1747 = vperm.xlu1 %2604, %v3011_v57  }
 0x144   :  { %v418_v23 = vpop.f32.mrf.mxu3 }
 0x145   :  { %v344_v9 = vpop.f32.mrf.mxu0  ;;  %v385_v10 = vpop.f32.mrf.mxu1 }
 0x146   :  { %v352_v11 = vpack.c.bf16 %v344_v9, %v342_v6  ;;  %v447_v12 = vpack.c.bf16 %v385_v10, %v383_v7  ;;  %2603 = vset.pattern.permute.xlu2 %v2656_v8 }
 0x147   :  { %2116 = vperm.xlu2 %2603, %v2849_v46  }
 0x148   :  { %555 = vmatmul.bf16.gmra.mxu0 %v447_v12  ;;  %692 = vmatmul.bf16.vlgmr.msrb.gmra.mxu3 %v352_v11 }
 0x149   :  { %2607 = vset.pattern.permute.xlu1 %v2655_v5 }
 0x14a   :  { %1930 = vperm.xlu1 %2607, %v2986_v47  }
 0x14c   :  { %v420_v25 = vpop.f32.mrf.mxu3 }
 0x14d   :  { %v347_v13 = vpop.f32.mrf.mxu0  ;;  %v388_v14 = vpop.f32.mrf.mxu1  ;;  %v454_v51 = vpack.c.bf16 %v420_v25, %v418_v23 }
 0x14f   :  { %2605 = vset.pattern.permute.xlu2 %v2654_v63  ;;  %v2611_v63 = vld [vmem:[%s4393_s6] ss:$0 sm:$0xff] }
 0x150   :  { %1750 = vperm.xlu2 %2605, %v2986_v47  }
 0x152   :  { %2609 = vset.pattern.permute.xlu1 %v2656_v8 }
 0x153   :  { %2110 = vperm.xlu1 %2609, %v2986_v47   ;;  %v3066_v47 = vpop.permute.xlu0 %846 }
 0x154   :  { %v423_v28 = vpop.f32.mrf.mxu3  ;;  %4443 = vst [vmem:[#allocation7_spill] sm:$0xff] %v3066_v47 }
 0x155   :  { %v349_v16 = vpop.f32.mrf.mxu0  ;;  %v390_v17 = vpop.f32.mrf.mxu1 }
 0x156   :  { %v353_v18 = vpack.c.bf16 %v349_v16, %v347_v13  ;;  %v448_v19 = vpack.c.bf16 %v390_v17, %v388_v14  ;;  %v3130_v14 = vpop.permute.xlu2 %1396 }
 0x157   :  { %4452 = vst [vmem:[#allocation16_spill] sm:$0xff] %v3130_v14 }
 0x158   :  { %560 = vmatmul.bf16.gmra.mxu0 %v448_v19  ;;  %697 = vmatmul.bf16.gmra.mxu3 %v353_v18 }
 0x159   :  { %2608 = vset.pattern.permute.xlu2 %v2656_v8 }
 0x15a   :  { %2107 = vperm.xlu2 %2608, %v3011_v57  }
 0x15c   :  { %v425_v33 = vpop.f32.mrf.mxu3 }
 0x15d   :  { %v393_v20 = vpop.f32.mrf.mxu1  ;;  %v455_v61 = vpack.c.bf16 %v425_v33, %v423_v28 }
 0x164   :  { %v3052_v36 = vpop.f32.mrf.mxu3 }
 0x165   :  { %v395_v46 = vpop.f32.mrf.mxu1 }
 0x166   :  { %v449_v22 = vpack.c.bf16 %v395_v46, %v393_v20 }
 0x168   :  { %565 = vmatmul.bf16.vlgmr.msra.gmra.mxu2 %v449_v22 }
 0x16b   :  { %v3208_v25 = vpop.permute.xlu2 %1027 }
 0x16c   :  { %v3056_v40 = vpop.f32.mrf.mxu3  ;;  %vm1038_vm12 = vcmp.eq.s32.totalorder %v3208_v25, 1 }
 0x16d   :  { %v398_v24 = vpop.f32.mrf.mxu1 }
 0x174   :  { %v3062_v43 = vpop.f32.mrf.mxu3 }
 0x175   :  { %v400_v26 = vpop.f32.mrf.mxu1 }
 0x176   :  { %v450_v27 = vpack.c.bf16 %v400_v26, %v398_v24  ;;  %v456_v24 = vpack.c.bf16 %v3056_v40, %v3052_v36 }
 0x178   :  { %570 = vmatmul.bf16.gmra.mxu2 %v450_v27 }
 0x17c   :  { %v3070_v49 = vpop.f32.mrf.mxu3 }
 0x17d   :  { %v403_v29 = vpop.f32.mrf.mxu1 }
 0x183   :  { %v3074_v52 = vpop.permute.xlu0 %840 }
 0x184   :  { %v3078_v55 = vpop.f32.mrf.mxu3  ;;  %vm851_vm13 = vcmp.eq.s32.totalorder %v3074_v52, 1 }
 0x185   :  { %v405_v30 = vpop.f32.mrf.mxu1  ;;  %v3048_v31 = vpop.f32.mrf.mxu0 }
 0x186   :  { %v451_v32 = vpack.c.bf16 %v405_v30, %v403_v29 }
 0x188   :  { %575 = vmatmul.bf16.gmra.mxu2 %v451_v32 }
 0x18c   :  { %v3084_v58 = vpop.permute.xlu0 %1387  ;;  %v3088_v3 = vpop.f32.mrf.mxu3 }
 0x18d   :  { %v408_v34 = vpop.f32.mrf.mxu1  ;;  %v3050_v35 = vpop.f32.mrf.mxu0  ;;  %vm1398_vm5 = vcmp.eq.s32.totalorder %v3084_v58, 1 }
 0x195   :  { %v410_v37 = vpop.f32.mrf.mxu1  ;;  %v3054_v38 = vpop.f32.mrf.mxu0 }
 0x196   :  { %v452_v39 = vpack.c.bf16 %v410_v37, %v408_v34  ;;  %v3097_v0 = vpop.permute.xlu0 %1576  ;;  %v3165_v37 = vpop.permute.xlu1 %843 }
 0x197   :  { %4449 = vst [vmem:[#allocation13_spill] sm:$0xff] %v3097_v0 }
 0x198   :  { %580 = vmatmul.bf16.gmra.mxu2 %v452_v39  ;;  %4454 = vst [vmem:[#allocation18_spill] sm:$0xff] %v3165_v37 }
 0x19d   :  { %v3058_v41 = vpop.f32.mrf.mxu0 }
 0x19e   :  { %v3158_v29 = vpop.permute.xlu0 %1570 }
 0x19f   :  { %4453 = vst [vmem:[#allocation17_spill] sm:$0xff] %v3158_v29 }
 0x1a5   :  { %v3064_v44 = vpop.f32.mrf.mxu0 }
 0x1a8   :  { %585 = vmatmul.bf16.gmra.mxu2 %v453_v45 }
 0x1ad   :  { %v3068_v48 = vpop.f32.mrf.mxu0 }
 0x1b5   :  { %v3072_v50 = vpop.f32.mrf.mxu0 }
 0x1b8   :  { %590 = vmatmul.bf16.gmra.mxu2 %v454_v51 }
 0x1bd   :  { %v3082_v57 = vpop.f32.mrf.mxu0 }
 0x1c5   :  { %v3090_v60 = vpop.f32.mrf.mxu0 }
 0x1c6   :  { %4447 = vst [vmem:[#allocation11_spill] sm:$0xff] %v3090_v60 }
 0x1c8   :  { %595 = vmatmul.bf16.gmra.mxu2 %v455_v61 }
 0x1cb   :  { %v693_v2 = vpop.f32.mrf.mxu3 }
 0x1cc   :  { %v3101_v4 = vadd.f32 %v2611_v63, %v693_v2 }
 0x1cd   :  { %v3103_v5 = vpop.f32.mrf.mxu0 }
 0x1ce   :  { %4451 = vst [vmem:[#allocation15_spill] sm:$0xff] %v3103_v5  ;;  %v3106_v6 = vrot.slane %v3101_v4, 1  ;;  %v3109_v7 = vrot.slane %v3101_v4, 2  ;;  %v3112_v8 = vrot.slane %v3101_v4, 3  ;;  %v3115_v9 = vrot.slane %v3101_v4, 4 }
 0x1cf   :  { %v3118_v10 = vrot.slane %v3101_v4, 5  ;;  %v3121_v11 = vrot.slane %v3101_v4, 6  ;;  %v3124_v12 = vrot.slane %v3101_v4, 7  ;;  %v3128_v13 = vadd.f32 %v3101_v4, %v3072_v50 }
 0x1d0   :  { %v1862_v15 = vadd.f32 %v3109_v7, %v3048_v31  ;;  %v1863_v16 = vadd.f32 %v3112_v8, %v3050_v35  ;;  %v1864_v17 = vadd.f32 %v3115_v9, %v3054_v38  ;;  %v3140_v18 = vadd.f32 %v3106_v6, %v3082_v57 }
 0x1d1   :  { %v1865_v19 = vadd.f32 %v3118_v10, %v3058_v41  ;;  %v3146_v20 = vadd.f32 %v3121_v11, %v3064_v44  ;;  %v3150_v21 = vadd.f32 %v3124_v12, %v3068_v48  ;;  %v3170_v45 = vadd.f32 %v3106_v6, %v3048_v31 }
 0x1d2   :  { %v1894_v46 = vmax.f32 %v1862_v15, 0.0  ;;  %v1895_v22 = vmax.f32 %v1863_v16, 0.0  ;;  %v1896_v23 = vmax.f32 %v1864_v17, 0.0  ;;  %v1901_v34 = vmax.f32 %v3140_v18, 0.0 }
 0x1d3   :  { %v695_v27 = vpop.f32.mrf.mxu3  ;;  %v1897_v28 = vmax.f32 %v1865_v19, 0.0  ;;  %v1898_v32 = vmax.f32 %v3146_v20, 0.0  ;;  %v1899_v36 = vmax.f32 %v3150_v21, 0.0  ;;  %v1322_v52 = vadd.f32 %v3118_v10, %v3048_v31 }
 0x1d4   :  { %v3160_v30 = vadd.f32 %v2611_v63, %v695_v27  ;;  %v1974_v39 = vrot.slane %v1894_v46, 6  ;;  %v1975_v40 = vrot.slane %v1895_v22, 5  ;;  %v1977_v2 = vrot.slane %v1896_v23, 4 }
 0x1d5   :  { %v3172_v51 = vpop.f32.mrf.mxu0  ;;  %v1979_v15 = vrot.slane %v1897_v28, 3 }
 0x1d6   :  { %4455 = vst [vmem:[#allocation19_spill] sm:$0xff] %v3172_v51  ;;  %v3175_v61 = vrot.slane %v3160_v30, 1  ;;  %v3178_v63 = vrot.slane %v3160_v30, 2  ;;  %v3181_v16 = vrot.slane %v3160_v30, 6  ;;  %v3184_v17 = vrot.slane %v3160_v30, 7 }
 0x1d7   :  { %v775_v18 = vadd.f32 %v3160_v30, %v3090_v60  ;;  %v971_v19 = vadd.f32 %v3160_v30, %v3103_v5  ;;  %v3191_v20 = vrot.slane %v3160_v30, 4  ;;  %v3200_v23 = vrot.slane %v3160_v30, 5 }
 0x1d8   :  { %v776_v21 = vadd.f32 %v3175_v61, %v3103_v5  ;;  %v777_v46 = vadd.f32 %v3178_v63, %v3172_v51  ;;  %v972_v22 = vadd.f32 %v3175_v61, %v3172_v51  ;;  %600 = vmatmul.bf16.gmra.mxu2 %v456_v24  ;;  %v970_v27 = vadd.f32 %v3184_v17, %v3090_v60 }
 0x1d9   :  { %v1150_v28 = vadd.f32 %v3181_v16, %v3090_v60  ;;  %v1152_v26 = vadd.f32 %v3160_v30, %v3172_v51  ;;  %v807_v33 = vmax.f32 %v775_v18, 0.0  ;;  %v1151_v24 = vadd.f32 %v3184_v17, %v3103_v5 }
 0x1da   :  { %v808_v53 = vmax.f32 %v776_v21, 0.0  ;;  %v809_v0 = vmax.f32 %v777_v46, 0.0  ;;  %v1002_v14 = vmax.f32 %v970_v27, 0.0  ;;  %v1003_v1 = vmax.f32 %v971_v19, 0.0 }
 0x1db   :  { %v1182_v59 = vmax.f32 %v1150_v28, 0.0  ;;  %v1332_v62 = vadd.f32 %v3184_v17, %v3172_v51  ;;  %v1004_v42 = vmax.f32 %v972_v22, 0.0  ;;  %v1183_v54 = vmax.f32 %v1151_v24, 0.0 }
 0x1dc   :  { %v908_v56 = vrot.slane %v808_v53, 7  ;;  %v910_v47 = vrot.slane %v809_v0, 6  ;;  %v1088_v29 = vrot.slane %v1002_v14, 1  ;;  %v1512_v21 = vadd.f32 %v3181_v16, %v3172_v51  ;;  %v1928_v53 = vpop.permute.xlu0 %1927  ;;  %v3221_v0 = vpop.permute.xlu1 %1030 }
 0x1dd   :  { %v1268_v60 = vrot.slane %v1182_v59, 2  ;;  %v1364_v18 = vmax.f32 %v1332_v62, 0.0  ;;  %v1269_v5 = vrot.slane %v1183_v54, 1  ;;  %v1692_v19 = vadd.f32 %v3200_v23, %v3172_v51 }
 0x1de   :  { %v909_v46 = vsel %vm4429_vm9, %v908_v56, %v807_v33  ;;  %v1872_v27 = vadd.f32 %v3191_v20, %v3172_v51  ;;  %v1184_v22 = vmax.f32 %v1152_v26, 0.0  ;;  %v1981_v14 = vrot.slane %v1898_v32, 2 }
 0x1df   :  { %v1983_v59 = vrot.slane %v1899_v36, 1  ;;  %v1986_v62 = vrot.slane %v1901_v34, 7  ;;  %v3224_v28 = vsel %vm4430_vm2, %v910_v47, %v909_v46  ;;  %v1089_v56 = vsel %vm4429_vm9, %v1003_v1, %v1088_v29  ;;  %v3243_v29 = vpop.permute.xlu2 %1573 }
 0x1e0   :  { %v1090_v54 = vrot.slane %v1004_v42, 7  ;;  %v3227_v33 = vrot.slane %v1364_v18, 1  ;;  %v1270_v24 = vsel %vm4429_vm9, %v1269_v5, %v1268_v60  ;;  %v1544_v37 = vmax.f32 %v1512_v21, 0.0  ;;  %4457 = vst [vmem:[#allocation21_spill] sm:$0xff] %v3243_v29 }
 0x1e1   :  { %vm1938_vm11 = vcmp.eq.s32.totalorder %v1928_v53, 1  ;;  %v1976_v51 = vsel %vm4429_vm9, %v1975_v40, %v1974_v39  ;;  %v2043_v26 = vadd.f32 %v3109_v7, %v3050_v35  ;;  %v1724_v32 = vmax.f32 %v1692_v19, 0.0 }
 0x1e2   :  { %4456 = vst [vmem:[#allocation20_spill] sm:$0xff] %v3227_v33  ;;  %v1904_v36 = vmax.f32 %v1872_v27, 0.0  ;;  %v1978_v34 = vsel %vm4430_vm2, %v1977_v2, %v1976_v51  ;;  %v2044_v47 = vadd.f32 %v3112_v8, %v3054_v38  ;;  %v2045_v1 = vadd.f32 %v3115_v9, %v3058_v41 }
 0x1e3   :  { %v1980_v42 = vsel %vm894_vm3, %v1979_v15, %v1978_v34  ;;  %v2046_v60 = vadd.f32 %v3118_v10, %v3064_v44  ;;  %v2047_v5 = vadd.f32 %v3121_v11, %v3068_v48  ;;  %v2048_v40 = vadd.f32 %v3124_v12, %v3072_v50 }
 0x1e4   :  { %v1982_v39 = vsel %vm897_vm6, %v1981_v14, %v1980_v42  ;;  %v3250_v51 = vadd.f32 %v3101_v4, %v3082_v57  ;;  %v2074_v2 = vmax.f32 %v3170_v45, 0.0  ;;  %v2075_v18 = vmax.f32 %v2043_v26, 0.0 }
 0x1e5   :  { %v1984_v15 = vsel %vm900_vm8, %v1983_v59, %v1982_v39  ;;  %v2076_v21 = vmax.f32 %v2044_v47, 0.0  ;;  %v2077_v46 = vmax.f32 %v2045_v1, 0.0  ;;  %v3255_v19 = vsel %vm4430_vm2, %v1090_v54, %v1089_v56 }
 0x1e6   :  { %4458 = vst [vmem:[#allocation22_spill] sm:$0xff] %v3255_v19  ;;  %v3258_v27 = vsel %vm4430_vm2, %v1184_v22, %v1270_v24  ;;  %v3260_v14 = vrot.slane %v1544_v37, 2  ;;  %v4461_v34 = vmax.f32 %v3128_v13, 0.0  ;;  %v3265_v29 = vrot.slane %v1724_v32, 3  ;;  %v3272_v37 = vpop.permute.xlu1 %1207 }
 0x1e7   :  { %4459 = vst [vmem:[#allocation23_spill] sm:$0xff] %v3258_v27  ;;  %v3267_v45 = vrot.slane %v1904_v36, 4  ;;  %v2154_v59 = vrot.slane %v2074_v2, 7  ;;  %v2155_v26 = vrot.slane %v2075_v18, 6  ;;  %v2078_v47 = vmax.f32 %v2046_v60, 0.0 }
 0x1e8   :  { %4460 = vst [vmem:[#allocation24_spill] sm:$0xff] %v3260_v14  ;;  %v1985_v42 = vsel %vm903_vm7, %v4461_v34, %v1984_v15  ;;  %v2079_v1 = vmax.f32 %v2047_v5, 0.0  ;;  %v2080_v39 = vmax.f32 %v2048_v40, 0.0  ;;  %v2157_v56 = vrot.slane %v2076_v21, 5 }
 0x1e9   :  { %4462 = vst [vmem:[#allocation25_spill] sm:$0xff] %v3265_v29  ;;  %v4464_v22 = vpack.c.bf16 %v3070_v49, %v3062_v43  ;;  %v1987_v13 = vsel %vm906_vm10, %v1986_v62, %v1985_v42  ;;  %v2156_v24 = vsel %vm4429_vm9, %v2155_v26, %v2154_v59  ;;  %v2159_v32 = vrot.slane %v2077_v46, 4 }
 0x1ea   :  { %4463 = vst [vmem:[#allocation26_spill] sm:$0xff] %v3267_v45  ;;  %v2158_v36 = vsel %vm4430_vm2, %v2157_v56, %v2156_v24  ;;  %v768_v60 = vadd.f32 %v3106_v6, %v3050_v35  ;;  %v769_v5 = vadd.f32 %v3109_v7, %v3054_v38  ;;  %v770_v43 = vadd.f32 %v3112_v8, %v3058_v41  ;;  %v3298_v56 = vpop.permute.xlu2 %1210 }
 0x1eb   :  { %605 = vmatmul.bf16.gmra.mxu2 %v4464_v22  ;;  %v767_v49 = vadd.f32 %v3101_v4, %v3048_v31  ;;  %v771_v62 = vadd.f32 %v3115_v9, %v3064_v44  ;;  %v772_v40 = vadd.f32 %v3118_v10, %v3068_v48  ;;  %v773_v2 = vadd.f32 %v3121_v11, %v3072_v50 }
 0x1ec   :  { %v3293_v15 = vsel %vm1938_vm11, %v1987_v13, 0.0  ;;  %v2160_v18 = vsel %vm894_vm3, %v2159_v32, %v2158_v36  ;;  %v774_v21 = vadd.f32 %v3124_v12, %v3082_v57  ;;  %v800_v46 = vmax.f32 %v768_v60, 0.0 }
 0x1ed   :  { %4465 = vst [vmem:[#allocation27_spill] sm:$0xff] %v3293_v15  ;;  %v2161_v34 = vrot.slane %v2078_v47, 3  ;;  %v801_v42 = vmax.f32 %v769_v5, 0.0  ;;  %v802_v59 = vmax.f32 %v770_v43, 0.0  ;;  %v803_v26 = vmax.f32 %v771_v62, 0.0 }
 0x1ee   :  { %v2163_v22 = vrot.slane %v2079_v1, 2  ;;  %v3300_v24 = vrot.slane %v2080_v39, 1  ;;  %v804_v54 = vmax.f32 %v772_v40, 0.0  ;;  %v805_v45 = vmax.f32 %v773_v2, 0.0 }
 0x1ef   :  { %v2162_v53 = vsel %vm897_vm6, %v2161_v34, %v2160_v18  ;;  %v799_v13 = vmax.f32 %v767_v49, 0.0  ;;  %v887_v15 = vrot.slane %v800_v46, 7  ;;  %v890_v32 = vrot.slane %v801_v42, 6 }
 0x1f0   :  { %v806_v36 = vmax.f32 %v774_v21, 0.0  ;;  %v893_v29 = vrot.slane %v802_v59, 5  ;;  %v896_v14 = vrot.slane %v803_v26, 4  ;;  %v899_v60 = vrot.slane %v804_v54, 3 }
 0x1f1   :  { %v889_v47 = vsel %vm4429_vm9, %v887_v15, %v799_v13  ;;  %v902_v5 = vrot.slane %v805_v45, 2  ;;  %v962_v43 = vadd.f32 %v3124_v12, %v3048_v31  ;;  %v963_v1 = vadd.f32 %v3101_v4, %v3050_v35  ;;  %v3316_v45 = vpop.permute.xlu1 %1753 }
 0x1f2   :  { %v892_v39 = vsel %vm4430_vm2, %v890_v32, %v889_v47  ;;  %v964_v49 = vadd.f32 %v3106_v6, %v3054_v38  ;;  %v965_v62 = vadd.f32 %v3109_v7, %v3058_v41  ;;  %v966_v54 = vadd.f32 %v3112_v8, %v3064_v44  ;;  %4466 = vst [vmem:[#allocation28_spill] sm:$0xff] %v3316_v45 }
 0x1f3   :  { %v895_v40 = vsel %vm894_vm3, %v893_v29, %v892_v39  ;;  %v967_v2 = vadd.f32 %v3115_v9, %v3068_v48  ;;  %v968_v15 = vadd.f32 %v3118_v10, %v3072_v50  ;;  %v969_v18 = vadd.f32 %v3121_v11, %v3082_v57 }
 0x1f4   :  { %v898_v21 = vsel %vm897_vm6, %v896_v14, %v895_v40  ;;  %v905_v46 = vrot.slane %v806_v36, 1  ;;  %v994_v34 = vmax.f32 %v962_v43, 0.0  ;;  %v996_v42 = vmax.f32 %v964_v49, 0.0  ;;  %v3333_v36 = vpop.permute.xlu2 %1756 }
 0x1f5   :  { %v901_v59 = vsel %vm900_vm8, %v899_v60, %v898_v21  ;;  %v997_v26 = vmax.f32 %v965_v62, 0.0  ;;  %v998_v29 = vmax.f32 %v966_v54, 0.0  ;;  %v999_v13 = vmax.f32 %v967_v2, 0.0  ;;  %4467 = vst [vmem:[#allocation29_spill] sm:$0xff] %v3333_v36 }
 0x1f6   :  { %v904_v32 = vsel %vm903_vm7, %v902_v5, %v901_v59  ;;  %v995_v47 = vmax.f32 %v963_v1, 0.0  ;;  %v1000_v39 = vmax.f32 %v968_v15, 0.0  ;;  %v1074_v45 = vrot.slane %v994_v34, 1 }
 0x1f7   :  { %v3330_v33 = vsel %vm900_vm8, %v2163_v22, %v2162_v53  ;;  %v907_v27 = vsel %vm906_vm10, %v905_v46, %v904_v32  ;;  %v1001_v19 = vmax.f32 %v969_v18, 0.0  ;;  %v1076_v14 = vrot.slane %v996_v42, 7 }
 0x1f8   :  { %v1075_v43 = vsel %vm4429_vm9, %v995_v47, %v1074_v45  ;;  %v1078_v60 = vrot.slane %v997_v26, 6  ;;  %v1080_v49 = vrot.slane %v998_v29, 5  ;;  %v1082_v62 = vrot.slane %v999_v13, 4 }
 0x1f9   :  { %v4468_v5 = vpack.c.bf16 %v3088_v3, %v3078_v55  ;;  %v1077_v1 = vsel %vm4430_vm2, %v1076_v14, %v1075_v43  ;;  %v1084_v54 = vrot.slane %v1000_v39, 3  ;;  %v1142_v22 = vadd.f32 %v3121_v11, %v3048_v31  ;;  %v3360_v26 = vpop.permute.xlu1 %1390 }
 0x1fa   :  { %v1143_v53 = vadd.f32 %v3124_v12, %v3050_v35  ;;  %v1079_v40 = vsel %vm894_vm3, %v1078_v60, %v1077_v1  ;;  %v1144_v45 = vadd.f32 %v3101_v4, %v3054_v38  ;;  %v1145_v2 = vadd.f32 %v3106_v6, %v3058_v41 }
 0x1fb   :  { %610 = vmatmul.bf16.gmra.mxu2 %v4468_v5  ;;  %v1146_v55 = vadd.f32 %v3109_v7, %v3064_v44  ;;  %v1081_v3 = vsel %vm897_vm6, %v1080_v49, %v1079_v40  ;;  %v1147_v15 = vadd.f32 %v3112_v8, %v3068_v48  ;;  %v1148_v18 = vadd.f32 %v3115_v9, %v3072_v50 }
 0x1fc   :  { %v1149_v21 = vadd.f32 %v3118_v10, %v3082_v57  ;;  %v1083_v46 = vsel %vm900_vm8, %v1082_v62, %v1081_v3  ;;  %v1086_v34 = vrot.slane %v1001_v19, 2  ;;  %v1174_v42 = vmax.f32 %v1142_v22, 0.0  ;;  %v3375_v25 = vpop.permute.xlu2 %1933 }
 0x1fd   :  { %v1175_v59 = vmax.f32 %v1143_v53, 0.0  ;;  %vm1218_vm14 = vcmp.eq.s32.totalorder %v3272_v37, 1  ;;  %v1085_v29 = vsel %vm903_vm7, %v1084_v54, %v1083_v46  ;;  %v1177_v13 = vmax.f32 %v1145_v2, 0.0  ;;  %4469 = vst [vmem:[#allocation30_spill] sm:$0xff] %v3375_v25 }
 0x1fe   :  { %v1178_v32 = vmax.f32 %v1146_v55, 0.0  ;;  %v1179_v47 = vmax.f32 %v1147_v15, 0.0  ;;  %v954_v39 = vsel %vm851_vm13, %v907_v27, 0.0  ;;  %v1087_v14 = vsel %vm906_vm10, %v1086_v34, %v1085_v29 }
 0x1ff   :  { %v1180_v43 = vmax.f32 %v1148_v18, 0.0  ;;  %v1254_v60 = vrot.slane %v1174_v42, 2  ;;  %v1134_v19 = vsel %vm1038_vm12, %v1087_v14, 0.0  ;;  %v1176_v49 = vmax.f32 %v1144_v45, 0.0 }
 0x200   :  { %v1181_v62 = vmax.f32 %v1149_v21, 0.0  ;;  %v1255_v5 = vrot.slane %v1175_v59, 1  ;;  %v1258_v1 = vrot.slane %v1177_v13, 7  ;;  %v1260_v22 = vrot.slane %v1178_v32, 6 }
 0x201   :  { %v1262_v53 = vrot.slane %v1179_v47, 5  ;;  %v1264_v54 = vrot.slane %v1180_v43, 4  ;;  %v1323_v27 = vadd.f32 %v3121_v11, %v3050_v35  ;;  %v1324_v2 = vadd.f32 %v3124_v12, %v3054_v38 }
 0x202   :  { %v1256_v40 = vsel %vm4429_vm9, %v1255_v5, %v1254_v60  ;;  %v1325_v55 = vadd.f32 %v3101_v4, %v3058_v41  ;;  %v1326_v3 = vadd.f32 %v3106_v6, %v3064_v44  ;;  %v1327_v15 = vadd.f32 %v3109_v7, %v3068_v48 }
 0x203   :  { %v1257_v45 = vsel %vm4430_vm2, %v1176_v49, %v1256_v40  ;;  %v1328_v21 = vadd.f32 %v3112_v8, %v3072_v50  ;;  %v1329_v46 = vadd.f32 %v3115_v9, %v3082_v57  ;;  %v1354_v34 = vmax.f32 %v1322_v52, 0.0  ;;  %v3392_v40 = vpop.permute.xlu1 %1936 }
 0x204   :  { %v1259_v18 = vsel %vm894_vm3, %v1258_v1, %v1257_v45  ;;  %v1266_v59 = vrot.slane %v1181_v62, 3  ;;  %v1355_v29 = vmax.f32 %v1323_v27, 0.0  ;;  %v1356_v13 = vmax.f32 %v1324_v2, 0.0  ;;  %4470 = vst [vmem:[#allocation31_spill] sm:$0xff] %v3392_v40  ;;  %v3395_v62 = vpop.f32.mrf.mxu2 }
 0x205   :  { %v1261_v42 = vsel %vm897_vm6, %v1260_v22, %v1259_v18  ;;  %v1358_v47 = vmax.f32 %v1326_v3, 0.0  ;;  %v1359_v14 = vmax.f32 %v1327_v15, 0.0  ;;  %v1360_v43 = vmax.f32 %v1328_v21, 0.0 }
 0x206   :  { %v1263_v32 = vsel %vm900_vm8, %v1262_v53, %v1261_v42  ;;  %v1138_v60 = vadd.f32 %v1134_v19, %v954_v39  ;;  %v1434_v5 = vrot.slane %v1354_v34, 3  ;;  %v1435_v1 = vrot.slane %v1355_v29, 2 }
 0x207   :  { %v1265_v49 = vsel %vm903_vm7, %v1264_v54, %v1263_v32  ;;  %v1357_v52 = vmax.f32 %v1325_v55, 0.0  ;;  %v1361_v25 = vmax.f32 %v1329_v46, 0.0  ;;  %v1437_v22 = vrot.slane %v1356_v13, 1  ;;  %v2541_v46 = vld [vmem:[%s4394_s7 + $0x38] sm:$0xff]  ;;  %v1568_v13 = vpop.permute.xlu2 %1567 }
 0x208   :  { %v1267_v45 = vsel %vm906_vm10, %v1266_v59, %v1265_v49  ;;  %v1436_v27 = vsel %vm4429_vm9, %v1435_v1, %v1434_v5  ;;  %v1440_v2 = vrot.slane %v1358_v47, 7  ;;  %v1442_v39 = vrot.slane %v1359_v14, 6  ;;  %2292 = vmatpush.bf16.msra.mxu0 %v2541_v46  ;;  %v2540_v49 = vld [vmem:[%s4394_s7 + $0x30] sm:$0xff]  ;;  %2558 = vmatpush.bf16.msra.mxu3 %v2541_v46 }
 0x209   :  { %v1314_v53 = vsel %vm1218_vm14, %v1267_v45, 0.0  ;;  %v1438_v19 = vsel %vm4430_vm2, %v1437_v22, %v1436_v27  ;;  %v1444_v54 = vrot.slane %v1360_v43, 5  ;;  %v1502_v3 = vadd.f32 %v3115_v9, %v3048_v31 }
 0x20a   :  { %v1503_v55 = vadd.f32 %v3118_v10, %v3050_v35  ;;  %v1439_v15 = vsel %vm894_vm3, %v1357_v52, %v1438_v19  ;;  %v1504_v18 = vadd.f32 %v3121_v11, %v3054_v38  ;;  %v1505_v37 = vadd.f32 %v3124_v12, %v3058_v41 }
 0x20b   :  { %v1506_v21 = vadd.f32 %v3101_v4, %v3064_v44  ;;  %v1441_v34 = vsel %vm897_vm6, %v1440_v2, %v1439_v15  ;;  %v1507_v42 = vadd.f32 %v3106_v6, %v3068_v48  ;;  %v1508_v59 = vadd.f32 %v3109_v7, %v3072_v50 }
 0x20c   :  { %v1509_v29 = vadd.f32 %v3112_v8, %v3082_v57  ;;  %v1443_v32 = vsel %vm900_vm8, %v1442_v39, %v1441_v34  ;;  %v1534_v47 = vmax.f32 %v1502_v3, 0.0  ;;  %v1535_v14 = vmax.f32 %v1503_v55, 0.0  ;;  %2293 = vmatpush.bf16.msra.mxu0 %v2540_v49  ;;  %2559 = vmatpush.bf16.msra.mxu3 %v2540_v49 }
 0x20d   :  { %v1536_v43 = vmax.f32 %v1504_v18, 0.0  ;;  %vm1578_vm15 = vcmp.eq.s32.totalorder %v1568_v13, 1  ;;  %v1445_v5 = vsel %vm903_vm7, %v1444_v54, %v1443_v32  ;;  %v1446_v1 = vrot.slane %v1361_v25, 4  ;;  %v2539_v25 = vld [vmem:[%s4394_s7 + $0x28] sm:$0xff]  ;;  %v3435_v54 = vpop.permute.xlu1 %2113 }
 0x20e   :  { %v1537_v45 = vmax.f32 %v1505_v37, 0.0  ;;  %v1539_v52 = vmax.f32 %v1507_v42, 0.0  ;;  %v2166_v22 = vsel %vm903_vm7, %v3300_v24, %v3330_v33  ;;  %v1318_v27 = vadd.f32 %v1314_v53, %v1138_v60  ;;  %4471 = vst [vmem:[#allocation32_spill] sm:$0xff] %v3435_v54  ;;  %v3444_v37 = vpop.f32.mrf.mxu2 }
 0x20f   :  { %v1540_v2 = vmax.f32 %v1508_v59, 0.0  ;;  %v1614_v39 = vrot.slane %v1534_v47, 4  ;;  %v1447_v19 = vsel %vm906_vm10, %v1446_v1, %v1445_v5  ;;  %v1538_v3 = vmax.f32 %v1506_v21, 0.0  ;;  %v3469_v5 = vpop.f32.mrf.mxu0 }
 0x210   :  { %v1615_v55 = vrot.slane %v1535_v14, 3  ;;  %v1617_v15 = vrot.slane %v1536_v43, 2  ;;  %v1541_v18 = vmax.f32 %v1509_v29, 0.0  ;;  %v1619_v46 = vrot.slane %v1537_v45, 1  ;;  %2294 = vmatpush.bf16.msra.mxu0 %v2539_v25  ;;  %2560 = vmatpush.bf16.msra.mxu3 %v2539_v25 }
 0x211   :  { %v1622_v34 = vrot.slane %v1539_v52, 7  ;;  %v1624_v40 = vrot.slane %v1540_v2, 6  ;;  %v1682_v24 = vadd.f32 %v3112_v8, %v3048_v31  ;;  %v1683_v60 = vadd.f32 %v3115_v9, %v3050_v35 }
 0x212   :  { %v1616_v33 = vsel %vm4429_vm9, %v1615_v55, %v1614_v39  ;;  %v1684_v53 = vadd.f32 %v3118_v10, %v3054_v38  ;;  %v1685_v42 = vadd.f32 %v3121_v11, %v3058_v41  ;;  %v1686_v59 = vadd.f32 %v3124_v12, %v3064_v44 }
 0x213   :  { %v1618_v21 = vsel %vm4430_vm2, %v1617_v15, %v1616_v33  ;;  %v1687_v29 = vadd.f32 %v3101_v4, %v3068_v48  ;;  %v1688_v35 = vadd.f32 %v3106_v6, %v3072_v50  ;;  %v1689_v38 = vadd.f32 %v3109_v7, %v3082_v57 }
 0x214   :  { %v1620_v31 = vsel %vm894_vm3, %v1619_v46, %v1618_v21  ;;  %v1714_v8 = vmax.f32 %v1682_v24, 0.0  ;;  %v1715_v10 = vmax.f32 %v1683_v60, 0.0  ;;  %v1716_v32 = vmax.f32 %v1684_v53, 0.0 }
 0x215   :  { %v1621_v9 = vsel %vm897_vm6, %v1538_v3, %v1620_v31  ;;  %v1717_v41 = vmax.f32 %v1685_v42, 0.0  ;;  %v1626_v11 = vrot.slane %v1541_v18, 5  ;;  %v1718_v48 = vmax.f32 %v1686_v59, 0.0  ;;  %v1748_v3 = vpop.permute.xlu1 %1747 }
 0x216   :  { %v1623_v44 = vsel %vm900_vm8, %v1622_v34, %v1621_v9  ;;  %v1720_v4 = vmax.f32 %v1688_v35, 0.0  ;;  %v4472_v12 = vmax.f32 %v3250_v51, 0.0  ;;  %v1494_v57 = vsel %vm1398_vm5, %v1447_v19, 0.0  ;;  %v3492_v34 = vpop.f32.mrf.mxu2 }
 0x217   :  { %v1625_v6 = vsel %vm903_vm7, %v1624_v40, %v1623_v44  ;;  %v1794_v7 = vrot.slane %v1714_v8, 5  ;;  %v1498_v47 = vadd.f32 %v1494_v57, %v1318_v27  ;;  %v1795_v43 = vrot.slane %v1715_v10, 4 }
 0x218   :  { %v3463_v50 = vsel %vm906_vm10, %v4472_v12, %v2166_v22  ;;  %v1627_v14 = vsel %vm906_vm10, %v1626_v11, %v1625_v6  ;;  %v1797_v49 = vrot.slane %v1716_v32, 3  ;;  %v1719_v45 = vmax.f32 %v1687_v29, 0.0 }
 0x219   :  { %v1674_v1 = vsel %vm1578_vm15, %v1627_v14, 0.0  ;;  %v1721_v51 = vmax.f32 %v1689_v38, 0.0  ;;  %v1799_v52 = vrot.slane %v1717_v41, 2  ;;  %v1796_v22 = vsel %vm4429_vm9, %v1795_v43, %v1794_v7 }
 0x21a   :  { %v1801_v2 = vrot.slane %v1718_v48, 1  ;;  %v1804_v58 = vrot.slane %v1720_v4, 7  ;;  %v3474_v39 = vrot.slane %v3160_v30, 3  ;;  %v1798_v40 = vsel %vm4430_vm2, %v1797_v49, %v1796_v22 }
 0x21b   :  { %v973_v27 = vadd.f32 %v3178_v63, %v3469_v5  ;;  %v1153_v19 = vadd.f32 %v3175_v61, %v3469_v5  ;;  %v3483_v13 = vadd.f32 %v3160_v30, %v3469_v5  ;;  %v1800_v55 = vsel %vm894_vm3, %v1799_v52, %v1798_v40 }
 0x21c   :  { %v778_v15 = vadd.f32 %v3474_v39, %v3469_v5  ;;  %v1513_v18 = vadd.f32 %v3184_v17, %v3469_v5  ;;  %v1693_v46 = vadd.f32 %v3181_v16, %v3469_v5  ;;  %v1802_v25 = vsel %vm897_vm6, %v1801_v2, %v1800_v55 }
 0x21d   :  { %v1806_v33 = vrot.slane %v1721_v51, 6  ;;  %v1005_v24 = vmax.f32 %v973_v27, 0.0  ;;  %v1185_v60 = vmax.f32 %v1153_v19, 0.0  ;;  %v1803_v53 = vsel %vm900_vm8, %v1719_v45, %v1802_v25  ;;  %v4473_v51 = vld [vmem:[#allocation18_spill] sm:$0xff] }
 0x21e   :  { %v810_v21 = vmax.f32 %v778_v15, 0.0  ;;  %v1545_v42 = vmax.f32 %v1513_v18, 0.0  ;;  %v1725_v59 = vmax.f32 %v1693_v46, 0.0  ;;  %v1678_v29 = vadd.f32 %v1674_v1, %v1498_v47  ;;  %v3536_v55 = vpop.f32.mrf.mxu2 }
 0x21f   :  { %vm1758_vm0 = vcmp.eq.s32.totalorder %v1748_v3, 1  ;;  %v1805_v31 = vsel %vm903_vm7, %v1804_v58, %v1803_v53  ;;  %v1365_v35 = vmax.f32 %v3483_v13, 0.0  ;;  %v1092_v8 = vrot.slane %v1005_v24, 6 }
 0x220   :  { %v1807_v38 = vsel %vm906_vm10, %v1806_v33, %v1805_v31  ;;  %v1272_v9 = vrot.slane %v1185_v60, 7  ;;  %v3501_v10 = vadd.f32 %v3200_v23, %v3469_v5  ;;  %v912_v32 = vrot.slane %v810_v21, 5 }
 0x221   :  { %v3503_v41 = vrot.slane %v1545_v42, 1  ;;  %v779_v44 = vadd.f32 %v3191_v20, %v3395_v62  ;;  %v974_v11 = vadd.f32 %v3474_v39, %v3395_v62  ;;  %v3509_v48 = vrot.slane %v1725_v59, 2 }
 0x222   :  { %v1154_v4 = vadd.f32 %v3178_v63, %v3395_v62  ;;  %v1334_v12 = vadd.f32 %v3175_v61, %v3395_v62  ;;  %v3517_v57 = vadd.f32 %v3160_v30, %v3395_v62  ;;  %v1854_v6 = vsel %vm1758_vm0, %v1807_v38, 0.0 }
 0x223   :  { %v811_v7 = vmax.f32 %v779_v44, 0.0  ;;  %v1006_v47 = vmax.f32 %v974_v11, 0.0  ;;  %v780_v14 = vadd.f32 %v3200_v23, %v3444_v37  ;;  %v3521_v43 = vadd.f32 %v1854_v6, %v1678_v29 }
 0x224   :  { %v1186_v49 = vmax.f32 %v1154_v4, 0.0  ;;  %v1366_v1 = vmax.f32 %v1334_v12, 0.0  ;;  %v3525_v45 = vadd.f32 %v3184_v17, %v3395_v62  ;;  %vm852_vm4 = vcmp.eq.s32.totalorder %v4473_v51, 1 }
 0x225   :  { %v914_v52 = vrot.slane %v811_v7, 4  ;;  %v1546_v22 = vmax.f32 %v3517_v57, 0.0  ;;  %v812_v2 = vmax.f32 %v780_v14, 0.0  ;;  %v975_v58 = vadd.f32 %v3191_v20, %v3444_v37 }
 0x226   :  { %vm1039_vm1 = vcmp.eq.s32.totalorder %v3221_v0, 1  ;;  %v1094_v40 = vrot.slane %v1006_v47, 5  ;;  %v1274_v27 = vrot.slane %v1186_v49, 6  ;;  %v1155_v19 = vadd.f32 %v3474_v39, %v3444_v37  ;;  %v3554_v47 = vpop.permute.xlu2 %2116 }
 0x227   :  { %v1335_v3 = vadd.f32 %v3178_v63, %v3444_v37  ;;  %v3538_v15 = vrot.slane %v1366_v1, 7  ;;  %v1007_v18 = vmax.f32 %v975_v58, 0.0  ;;  %v781_v46 = vadd.f32 %v3181_v16, %v3492_v34  ;;  %4474 = vst [vmem:[#allocation18_spill] sm:$0xff] %v3554_v47  ;;  %v4475_v1 = vld [vmem:[#allocation22_spill] sm:$0xff] }
 0x228   :  { %v976_v25 = vadd.f32 %v3200_v23, %v3492_v34  ;;  %vm1219_vm11 = vcmp.eq.s32.totalorder %v3298_v56, 1  ;;  %v916_v33 = vrot.slane %v812_v2, 3  ;;  %v1187_v24 = vmax.f32 %v1155_v19, 0.0 }
 0x229   :  { %v1367_v60 = vmax.f32 %v1335_v3, 0.0  ;;  %v1156_v53 = vadd.f32 %v3191_v20, %v3492_v34  ;;  %v1096_v21 = vrot.slane %v1007_v18, 4  ;;  %v813_v42 = vmax.f32 %v781_v46, 0.0 }
 0x22a   :  { %v1008_v59 = vmax.f32 %v976_v25, 0.0  ;;  %v782_v29 = vadd.f32 %v3184_v17, %v3536_v55  ;;  %v1276_v31 = vrot.slane %v1187_v24, 5  ;;  %v977_v44 = vadd.f32 %v3181_v16, %v3536_v55 }
 0x22b   :  { %v1188_v38 = vmax.f32 %v1156_v53, 0.0  ;;  %v913_v11 = vsel %vm894_vm3, %v912_v32, %v3224_v28  ;;  %v918_v4 = vrot.slane %v813_v42, 2  ;;  %v1093_v2 = vsel %vm894_vm3, %v1092_v8, %v4475_v1  ;;  %v4476_v32 = vld [vmem:[#allocation23_spill] sm:$0xff] }
 0x22c   :  { %v1098_v12 = vrot.slane %v1008_v59, 3  ;;  %v814_v6 = vmax.f32 %v782_v29, 0.0  ;;  %v915_v7 = vsel %vm897_vm6, %v914_v52, %v913_v11  ;;  %v1009_v14 = vmax.f32 %v977_v44, 0.0  ;;  %v4478_v11 = vld [vmem:[#allocation15_spill] sm:$0xff] }
 0x22d   :  { %v917_v49 = vsel %vm900_vm8, %v916_v33, %v915_v7  ;;  %v1157_v58 = vadd.f32 %v3200_v23, %v3536_v55  ;;  %v1095_v28 = vsel %vm897_vm6, %v1094_v40, %v1093_v2  ;;  %v1273_v18 = vsel %vm894_vm3, %v1272_v9, %v4476_v32  ;;  %v4477_v9 = vld [vmem:[#allocation11_spill] sm:$0xff] }
 0x22e   :  { %v919_v19 = vsel %vm903_vm7, %v918_v4, %v917_v49  ;;  %v920_v3 = vrot.slane %v814_v6, 1  ;;  %v1097_v52 = vsel %vm900_vm8, %v1096_v21, %v1095_v28  ;;  %v1100_v46 = vrot.slane %v1009_v14, 2 }
 0x22f   :  { %v1189_v25 = vmax.f32 %v1157_v58, 0.0  ;;  %v1275_v33 = vsel %vm897_vm6, %v1274_v27, %v1273_v18  ;;  %v1099_v8 = vsel %vm903_vm7, %v1098_v12, %v1097_v52  ;;  %v1278_v42 = vrot.slane %v1188_v38, 4  ;;  %v3594_v52 = vpop.permute.xlu2 %1750 }
 0x230   :  { %v921_v24 = vsel %vm906_vm10, %v920_v3, %v919_v19  ;;  %v1277_v53 = vsel %vm900_vm8, %v1276_v31, %v1275_v33  ;;  %v1101_v40 = vsel %vm906_vm10, %v1100_v46, %v1099_v8  ;;  %v1330_v21 = vadd.f32 %v3200_v23, %v4477_v9  ;;  %v4479_v33 = vld [vmem:[#allocation17_spill] sm:$0xff] }
 0x231   :  { %v955_v59 = vsel %vm852_vm4, %v921_v24, 0.0  ;;  %v1280_v29 = vrot.slane %v1189_v25, 3  ;;  %v1135_v44 = vsel %vm1039_vm1, %v1101_v40, 0.0  ;;  %v1279_v27 = vsel %vm903_vm7, %v1278_v42, %v1277_v53 }
 0x232   :  { %v1331_v4 = vadd.f32 %v3181_v16, %v4478_v11  ;;  %v1336_v31 = vadd.f32 %v3474_v39, %v3492_v34  ;;  %v1139_v38 = vadd.f32 %v1135_v44, %v955_v59  ;;  %v1337_v12 = vadd.f32 %v3191_v20, %v3536_v55  ;;  %v4480_v59 = vld [vmem:[#allocation20_spill] sm:$0xff] }
 0x233   :  { %v1281_v51 = vsel %vm906_vm10, %v1280_v29, %v1279_v27  ;;  %v1362_v6 = vmax.f32 %v1330_v21, 0.0  ;;  %vm1399_vm13 = vcmp.eq.s32.totalorder %v3360_v26, 1  ;;  %v1456_v49 = vrot.slane %v1367_v60, 6 }
 0x234   :  { %v1315_v0 = vsel %vm1219_vm11, %v1281_v51, 0.0  ;;  %v1363_v7 = vmax.f32 %v1331_v4, 0.0  ;;  %v1368_v14 = vmax.f32 %v1336_v31, 0.0  ;;  %v1369_v2 = vmax.f32 %v1337_v12, 0.0 }
 0x235   :  { %v1319_v1 = vadd.f32 %v1315_v0, %v1139_v38  ;;  %v1448_v58 = vrot.slane %v1362_v6, 3  ;;  %v1510_v19 = vadd.f32 %v3191_v20, %v4477_v9  ;;  %v1511_v32 = vadd.f32 %v3200_v23, %v4478_v11 }
 0x236   :  { %v1449_v3 = vrot.slane %v1363_v7, 2  ;;  %v1458_v28 = vrot.slane %v1368_v14, 5  ;;  %v1515_v18 = vadd.f32 %v3175_v61, %v3444_v37  ;;  %v1460_v56 = vrot.slane %v1369_v2, 4  ;;  %v2538_v2 = vld [vmem:[%s4394_s7 + $0x20] sm:$0xff] }
 0x237   :  { %v1516_v60 = vadd.f32 %v3178_v63, %v3492_v34  ;;  %v1517_v46 = vadd.f32 %v3474_v39, %v3536_v55  ;;  %v1542_v25 = vmax.f32 %v1510_v19, 0.0  ;;  %vm1579_vm12 = vcmp.eq.s32.totalorder %v4479_v33, 1  ;;  %v4481_v19 = vld [vmem:[#allocation24_spill] sm:$0xff]  ;;  %2295 = vmatpush.bf16.msra.mxu0 %v2538_v2  ;;  %2561 = vmatpush.bf16.msra.mxu3 %v2538_v2 }
 0x238   :  { %v1450_v24 = vsel %vm4429_vm9, %v1449_v3, %v1448_v58  ;;  %v1543_v8 = vmax.f32 %v1511_v32, 0.0  ;;  %v1547_v53 = vmax.f32 %v1515_v18, 0.0  ;;  %v1690_v42 = vadd.f32 %v3474_v39, %v4477_v9 }
 0x239   :  { %v1452_v40 = vsel %vm4430_vm2, %v4480_v59, %v1450_v24  ;;  %v1548_v29 = vmax.f32 %v1516_v60, 0.0  ;;  %v1549_v21 = vmax.f32 %v1517_v46, 0.0  ;;  %v1628_v44 = vrot.slane %v1542_v25, 4 }
 0x23a   :  { %v1453_v27 = vsel %vm894_vm3, %v1365_v35, %v1452_v40  ;;  %v1629_v4 = vrot.slane %v1543_v8, 3  ;;  %v1636_v31 = vrot.slane %v1547_v53, 7  ;;  %v1691_v38 = vadd.f32 %v3191_v20, %v4478_v11  ;;  %v3643_v40 = vpop.permute.xlu2 %2107 }
 0x23b   :  { %v1455_v51 = vsel %vm897_vm6, %v3538_v15, %v1453_v27  ;;  %v1638_v12 = vrot.slane %v1548_v29, 6  ;;  %v1640_v6 = vrot.slane %v1549_v21, 5  ;;  %v1695_v0 = vadd.f32 %v3160_v30, %v3444_v37  ;;  %v3624_v15 = vpop.f32.mrf.mxu2 }
 0x23c   :  { %v1457_v7 = vsel %vm900_vm8, %v1456_v49, %v1455_v51  ;;  %v1630_v14 = vsel %vm4429_vm9, %v1629_v4, %v1628_v44  ;;  %v1696_v13 = vadd.f32 %v3175_v61, %v3492_v34  ;;  %v1697_v35 = vadd.f32 %v3178_v63, %v3536_v55  ;;  %v2536_v4 = vld [vmem:[%s4394_s7 + $0x10] sm:$0xff] }
 0x23d   :  { %v1459_v58 = vsel %vm903_vm7, %v1458_v28, %v1457_v7  ;;  %v1632_v3 = vsel %vm4430_vm2, %v4481_v19, %v1630_v14  ;;  %v1722_v49 = vmax.f32 %v1690_v42, 0.0  ;;  %v1723_v32 = vmax.f32 %v1691_v38, 0.0  ;;  %v4482_v38 = vld [vmem:[#allocation25_spill] sm:$0xff] }
 0x23e   :  { %vm1759_vm14 = vcmp.eq.s32.totalorder %v3594_v52, 1  ;;  %v1461_v18 = vsel %vm906_vm10, %v1460_v56, %v1459_v58  ;;  %v1634_v60 = vsel %vm894_vm3, %v3503_v41, %v1632_v3  ;;  %v1726_v46 = vmax.f32 %v3525_v45, 0.0  ;;  %v2537_v56 = vld [vmem:[%s4394_s7 + $0x18] sm:$0xff]  ;;  %v2534_v52 = vld [vmem:[%s4394_s7] sm:$0xff] }
 0x23f   :  { %v1727_v25 = vmax.f32 %v1695_v0, 0.0  ;;  %v1495_v28 = vsel %vm1399_vm13, %v1461_v18, 0.0  ;;  %v1635_v24 = vsel %vm897_vm6, %v1546_v22, %v1634_v60  ;;  %v1728_v8 = vmax.f32 %v1696_v13, 0.0  ;;  %2296 = vmatpush.bf16.msra.mxu0 %v2537_v56  ;;  %2562 = vmatpush.bf16.msra.mxu3 %v2537_v56  ;;  %v3664_v0 = vpop.permute.xlu1 %1930  ;;  %v2535_v60 = vld [vmem:[%s4394_s7 + $0x8] sm:$0xff] }
 0x240   :  { %v1729_v53 = vmax.f32 %v1697_v35, 0.0  ;;  %v1499_v42 = vadd.f32 %v1495_v28, %v1319_v1  ;;  %v1637_v41 = vsel %vm900_vm8, %v1636_v31, %v1635_v24  ;;  %v1808_v45 = vrot.slane %v1722_v49, 5 }
 0x241   :  { %v1809_v59 = vrot.slane %v1723_v32, 4  ;;  %v1639_v26 = vsel %vm903_vm7, %v1638_v12, %v1637_v41  ;;  %v1815_v29 = vrot.slane %v1726_v46, 1  ;;  %v1818_v21 = vrot.slane %v1728_v8, 7 }
 0x242   :  { %v1820_v57 = vrot.slane %v1729_v53, 6  ;;  %v1641_v22 = vsel %vm906_vm10, %v1640_v6, %v1639_v26  ;;  %v1870_v27 = vadd.f32 %v3178_v63, %v4477_v9  ;;  %v1871_v1 = vadd.f32 %v3474_v39, %v4478_v11 }
 0x243   :  { %v1810_v44 = vsel %vm4429_vm9, %v1809_v59, %v1808_v45  ;;  %v1675_v31 = vsel %vm1579_vm12, %v1641_v22, 0.0  ;;  %v1874_v12 = vadd.f32 %v3181_v16, %v3395_v62  ;;  %v1875_v6 = vadd.f32 %v3184_v17, %v3444_v37  ;;  %v3672_v35 = vpop.f32.mrf.mxu2  ;;  %2297 = vmatpush.bf16.msra.mxu0 %v2536_v4  ;;  %2563 = vmatpush.bf16.msra.mxu3 %v2536_v4 }
 0x244   :  { %v1812_v51 = vsel %vm4430_vm2, %v4482_v38, %v1810_v44  ;;  %vm2118_vm5 = vcmp.eq.s32.totalorder %v3643_v40, 1  ;;  %v1679_v7 = vadd.f32 %v1675_v31, %v1499_v42  ;;  %v1876_v33 = vadd.f32 %v3160_v30, %v3492_v34 }
 0x245   :  { %v1814_v14 = vsel %vm894_vm3, %v3509_v48, %v1812_v51  ;;  %v1877_v13 = vadd.f32 %v3175_v61, %v3536_v55  ;;  %v1902_v58 = vmax.f32 %v1870_v27, 0.0  ;;  %v1903_v19 = vmax.f32 %v1871_v1, 0.0 }
 0x246   :  { %v1816_v2 = vsel %vm897_vm6, %v1815_v29, %v1814_v14  ;;  %v1905_v3 = vmax.f32 %v3501_v10, 0.0  ;;  %vm1939_vm15 = vcmp.eq.s32.totalorder %v3664_v0, 1  ;;  %v1906_v32 = vmax.f32 %v1874_v12, 0.0  ;;  %v4483_v29 = vld [vmem:[#allocation26_spill] sm:$0xff]  ;;  %v4486_v14 = vld [vmem:[#allocation27_spill] sm:$0xff] }
 0x247   :  { %v1817_v49 = vsel %vm900_vm8, %v1727_v25, %v1816_v2  ;;  %v1907_v48 = vmax.f32 %v1875_v6, 0.0  ;;  %v1908_v18 = vmax.f32 %v1876_v33, 0.0  ;;  %v1909_v28 = vmax.f32 %v1877_v13, 0.0  ;;  %2298 = vmatpush.bf16.msra.mxu0 %v2535_v60  ;;  %2564 = vmatpush.bf16.msra.mxu3 %v2535_v60  ;;  %v2111_v51 = vpop.permute.xlu1 %2110 }
 0x248   :  { %v1819_v46 = vsel %vm903_vm7, %v1818_v21, %v1817_v49  ;;  %v1988_v24 = vrot.slane %v1902_v58, 6  ;;  %v1989_v8 = vrot.slane %v1903_v19, 5  ;;  %v1993_v53 = vrot.slane %v1905_v3, 3 }
 0x249   :  { %v1821_v10 = vsel %vm906_vm10, %v1820_v57, %v1819_v46  ;;  %v1995_v56 = vrot.slane %v1906_v32, 2  ;;  %v1997_v42 = vrot.slane %v1907_v48, 1  ;;  %v2000_v45 = vrot.slane %v1909_v28, 7  ;;  %v4484_v57 = vld [vmem:[#allocation19_spill] sm:$0xff] }
 0x24a   :  { %v1855_v25 = vsel %vm1759_vm14, %v1821_v10, 0.0  ;;  %v1990_v41 = vsel %vm4429_vm9, %v1989_v8, %v1988_v24  ;;  %v2050_v59 = vadd.f32 %v3175_v61, %v4477_v9  ;;  %v2051_v22 = vadd.f32 %v3178_v63, %v4478_v11  ;;  %v698_v63 = vpop.f32.mrf.mxu3 }
 0x24b   :  { %v1859_v26 = vadd.f32 %v1855_v25, %v1679_v7  ;;  %v1992_v21 = vsel %vm4430_vm2, %v4483_v29, %v1990_v41  ;;  %v2052_v44 = vadd.f32 %v3474_v39, %v4484_v57  ;;  %v2053_v61 = vadd.f32 %v3191_v20, %v3469_v5  ;;  %v3709_v38 = vpop.f32.mrf.mxu2  ;;  %2299 = vmatpush.bf16.msra.mxu0 %v2534_v52 }
 0x24c   :  { %v1994_v27 = vsel %vm894_vm3, %v1993_v53, %v1992_v21  ;;  %v2054_v9 = vadd.f32 %v3200_v23, %v3395_v62  ;;  %v2055_v1 = vadd.f32 %v3181_v16, %v3444_v37  ;;  %v2056_v11 = vadd.f32 %v3184_v17, %v3492_v34  ;;  %2565 = vmatpush.bf16.msra.mxu3 %v2534_v52 }
 0x24d   :  { %v1996_v39 = vsel %vm897_vm6, %v1995_v56, %v1994_v27  ;;  %v2057_v4 = vadd.f32 %v3160_v30, %v3536_v55  ;;  %v2082_v31 = vmax.f32 %v2050_v59, 0.0  ;;  %v2083_v5 = vmax.f32 %v2051_v22, 0.0  ;;  %v3719_v30 = vld [vmem:[%s4393_s6] ss:$0 sm:$0xff] }
 0x24e   :  { %v1998_v20 = vsel %vm900_vm8, %v1997_v42, %v1996_v39  ;;  %v2084_v23 = vmax.f32 %v2052_v44, 0.0  ;;  %v2085_v62 = vmax.f32 %v2053_v61, 0.0  ;;  %v2086_v37 = vmax.f32 %v2054_v9, 0.0 }
 0x24f   :  { %v1999_v16 = vsel %vm903_vm7, %v1908_v18, %v1998_v20  ;;  %v2087_v12 = vmax.f32 %v2055_v1, 0.0  ;;  %v2088_v6 = vmax.f32 %v2056_v11, 0.0  ;;  %v2214_v17 = vsel %vm2118_vm5, %v3463_v50, 0.0 }
 0x250   :  { %v3722_v34 = vadd.f32 %v3719_v30, %v698_v63  ;;  %v2001_v55 = vsel %vm906_vm10, %v2000_v45, %v1999_v16  ;;  %v2168_v7 = vrot.slane %v2082_v31, 7  ;;  %v2038_v33 = vadd.f32 %v4486_v14, %v3521_v43 }
 0x251   :  { %v2169_v13 = vrot.slane %v2083_v5, 6  ;;  %v2171_v2 = vrot.slane %v2084_v23, 5  ;;  %v2173_v58 = vrot.slane %v2085_v62, 4  ;;  %v2035_v50 = vsel %vm1939_vm15, %v2001_v55, 0.0 }
 0x252   :  { %4485 = vst [vmem:[#allocation22_spill] sm:$0xff] %v3722_v34  ;;  %v2089_v40 = vmax.f32 %v2057_v4, 0.0  ;;  %vm2119_vm0 = vcmp.eq.s32.totalorder %v2111_v51, 1  ;;  %v2175_v19 = vrot.slane %v2086_v37, 3  ;;  %v2039_v3 = vadd.f32 %v2035_v50, %v1859_v26 }
 0x253   :  { %v2170_v49 = vsel %vm4429_vm9, %v2169_v13, %v2168_v7  ;;  %v2177_v32 = vrot.slane %v2087_v12, 2  ;;  %v2179_v48 = vrot.slane %v2088_v6, 1  ;;  %v3732_v60 = vrot.slane %v3722_v34, 3  ;;  %v3749_v10 = vpop.f32.mrf.mxu2 }
 0x254   :  { %v2172_v18 = vsel %vm4430_vm2, %v2171_v2, %v2170_v49  ;;  %v3735_v43 = vrot.slane %v3722_v34, 4  ;;  %v3738_v46 = vrot.slane %v3722_v34, 5  ;;  %v3742_v28 = vrot.slane %v3722_v34, 6 }
 0x255   :  { %v2174_v0 = vsel %vm894_vm3, %v2173_v58, %v2172_v18  ;;  %v3745_v24 = vrot.slane %v3722_v34, 7  ;;  %v783_v8 = vadd.f32 %v3722_v34, %v3624_v15  ;;  %v1698_v25 = vadd.f32 %v3732_v60, %v3624_v15 }
 0x256   :  { %v2176_v53 = vsel %vm897_vm6, %v2175_v19, %v2174_v0  ;;  %v1338_v56 = vadd.f32 %v3738_v46, %v3624_v15  ;;  %v1518_v42 = vadd.f32 %v3735_v43, %v3624_v15  ;;  %v3760_v45 = vrot.slane %v3722_v34, 2 }
 0x257   :  { %v2178_v41 = vsel %vm900_vm8, %v2177_v32, %v2176_v53  ;;  %v978_v59 = vadd.f32 %v3745_v24, %v3624_v15  ;;  %v1158_v26 = vadd.f32 %v3742_v28, %v3624_v15  ;;  %v1730_v57 = vmax.f32 %v1698_v25, 0.0 }
 0x258   :  { %v2180_v29 = vsel %vm903_vm7, %v2179_v48, %v2178_v41  ;;  %v1370_v21 = vmax.f32 %v1338_v56, 0.0  ;;  %v1550_v22 = vmax.f32 %v1518_v42, 0.0  ;;  %v2218_v52 = vadd.f32 %v2214_v17, %v2038_v33 }
 0x259   :  { %v2181_v44 = vsel %vm906_vm10, %v2089_v40, %v2180_v29  ;;  %v1010_v27 = vmax.f32 %v978_v59, 0.0  ;;  %v3770_v9 = vrot.slane %v3722_v34, 1  ;;  %v815_v1 = vmax.f32 %v783_v8, 0.0 }
 0x25a   :  { %v2215_v61 = vsel %vm2119_vm0, %v2181_v44, 0.0  ;;  %v1878_v63 = vadd.f32 %v3760_v45, %v3624_v15  ;;  %v1190_v11 = vmax.f32 %v1158_v26, 0.0  ;;  %v1462_v4 = vrot.slane %v1370_v21, 3 }
 0x25b   :  { %4487 = vst [vmem:[#allocation23_spill] sm:$0xff] %v3770_v9  ;;  %v2219_v39 = vadd.f32 %v2215_v61, %v2039_v3  ;;  %v1642_v31 = vrot.slane %v1550_v22, 4  ;;  %v1822_v20 = vrot.slane %v1730_v57, 5  ;;  %v784_v5 = vadd.f32 %v3770_v9, %v3672_v35  ;;  %v3784_v6 = vpop.f32.mrf.mxu2  ;;  %v700_v61 = vpop.f32.mrf.mxu3 }
 0x25c   :  { %v979_v23 = vadd.f32 %v3722_v34, %v3672_v35  ;;  %v1159_v62 = vadd.f32 %v3745_v24, %v3672_v35  ;;  %v1102_v16 = vrot.slane %v1010_v27, 1  ;;  %v1339_v37 = vadd.f32 %v3742_v28, %v3672_v35 }
 0x25d   :  { %v2222_v51 = vpack.c.bf16 %v2219_v39, %v2218_v52  ;;  %v1519_v12 = vadd.f32 %v3738_v46, %v3672_v35  ;;  %v1910_v17 = vmax.f32 %v1878_v63, 0.0  ;;  %v816_v55 = vmax.f32 %v784_v5, 0.0 }
 0x25e   :  { %v1011_v7 = vmax.f32 %v979_v23, 0.0  ;;  %v1191_v14 = vmax.f32 %v1159_v62, 0.0  ;;  %v1371_v33 = vmax.f32 %v1339_v37, 0.0  ;;  %v1699_v2 = vadd.f32 %v3735_v43, %v3672_v35 }
 0x25f   :  { %v1551_v13 = vmax.f32 %v1519_v12, 0.0  ;;  %v1879_v58 = vadd.f32 %v3732_v60, %v3672_v35  ;;  %2300 = vmatmul.bf16.vlgmr.msra.gmra.mxu0 %v2222_v51  ;;  %v1282_v50 = vrot.slane %v1190_v11, 2  ;;  %v922_v40 = vrot.slane %v816_v55, 7 }
 0x260   :  { %v1103_v19 = vsel %vm4429_vm9, %v1011_v7, %v1102_v16  ;;  %v1283_v3 = vrot.slane %v1191_v14, 1  ;;  %v1463_v49 = vrot.slane %v1371_v33, 2  ;;  %v1731_v48 = vmax.f32 %v1699_v2, 0.0 }
 0x261   :  { %v1643_v32 = vrot.slane %v1551_v13, 3  ;;  %v1911_v18 = vmax.f32 %v1879_v58, 0.0  ;;  %v2002_v0 = vrot.slane %v1910_v17, 6  ;;  %v923_v8 = vsel %vm4429_vm9, %v922_v40, %v815_v1 }
 0x262   :  { %v1284_v53 = vsel %vm4429_vm9, %v1283_v3, %v1282_v50  ;;  %v785_v56 = vadd.f32 %v3760_v45, %v3709_v38  ;;  %v1464_v42 = vsel %vm4429_vm9, %v1463_v49, %v1462_v4  ;;  %v1823_v41 = vrot.slane %v1731_v48, 4 }
 0x263   :  { %v1644_v25 = vsel %vm4429_vm9, %v1643_v32, %v1642_v31  ;;  %v2003_v59 = vrot.slane %v1911_v18, 5  ;;  %v980_v29 = vadd.f32 %v3770_v9, %v3709_v38  ;;  %v1160_v21 = vadd.f32 %v3722_v34, %v3709_v38  ;;  %v3809_v27 = vpop.f32.mrf.mxu2 }
 0x264   :  { %v817_v26 = vmax.f32 %v785_v56, 0.0  ;;  %v1824_v22 = vsel %vm4429_vm9, %v1823_v41, %v1822_v20  ;;  %v1340_v44 = vadd.f32 %v3745_v24, %v3709_v38  ;;  %v1520_v52 = vadd.f32 %v3742_v28, %v3709_v38 }
 0x265   :  { %v3803_v57 = vsel %vm4429_vm9, %v2003_v59, %v2002_v0  ;;  %v1012_v63 = vmax.f32 %v980_v29, 0.0  ;;  %v1192_v39 = vmax.f32 %v1160_v21, 0.0  ;;  %v1700_v31 = vadd.f32 %v3738_v46, %v3709_v38 }
 0x266   :  { %v924_v1 = vrot.slane %v817_v26, 6  ;;  %v1372_v11 = vmax.f32 %v1340_v44, 0.0  ;;  %v1552_v4 = vmax.f32 %v1520_v52, 0.0  ;;  %v3816_v62 = vadd.f32 %v3719_v30, %v700_v61 }
 0x267   :  { %v1104_v5 = vrot.slane %v1012_v63, 7  ;;  %v1285_v23 = vsel %vm4430_vm2, %v1192_v39, %v1284_v53  ;;  %v1732_v37 = vmax.f32 %v1700_v31, 0.0  ;;  %v2058_v12 = vadd.f32 %v3770_v9, %v3624_v15 }
 0x268   :  { %v925_v20 = vsel %vm4430_vm2, %v924_v1, %v923_v8  ;;  %v1465_v51 = vrot.slane %v1372_v11, 1  ;;  %v1645_v16 = vrot.slane %v1552_v4, 2  ;;  %v786_v55 = vadd.f32 %v3732_v60, %v3749_v10 }
 0x269   :  { %v1105_v17 = vsel %vm4430_vm2, %v1104_v5, %v1103_v19  ;;  %v981_v7 = vadd.f32 %v3760_v45, %v3749_v10  ;;  %v2059_v14 = vadd.f32 %v3760_v45, %v3672_v35  ;;  %v1825_v13 = vrot.slane %v1732_v37, 3 }
 0x26a   :  { %v1466_v30 = vsel %vm4430_vm2, %v1465_v51, %v1464_v42  ;;  %v1646_v33 = vsel %vm4430_vm2, %v1645_v16, %v1644_v25  ;;  %v1880_v2 = vadd.f32 %v3735_v43, %v3709_v38  ;;  %v818_v15 = vmax.f32 %v786_v55, 0.0 }
 0x26b   :  { %v1013_v58 = vmax.f32 %v981_v7, 0.0  ;;  %v1161_v50 = vadd.f32 %v3770_v9, %v3749_v10  ;;  %v3834_v40 = vsel %vm4430_vm2, %v1825_v13, %v1824_v22  ;;  %v2060_v19 = vadd.f32 %v3732_v60, %v3709_v38  ;;  %v3842_v49 = vpop.f32.mrf.mxu2 }
 0x26c   :  { %v1341_v35 = vadd.f32 %v3722_v34, %v3749_v10  ;;  %v1521_v3 = vadd.f32 %v3745_v24, %v3749_v10  ;;  %v926_v32 = vrot.slane %v818_v15, 5  ;;  %v1701_v0 = vadd.f32 %v3742_v28, %v3749_v10 }
 0x26d   :  { %v1106_v48 = vrot.slane %v1013_v58, 6  ;;  %v1193_v18 = vmax.f32 %v1161_v50, 0.0  ;;  %v2090_v8 = vmax.f32 %v2058_v12, 0.0  ;;  %v2091_v53 = vmax.f32 %v2059_v14, 0.0 }
 0x26e   :  { %v1373_v56 = vmax.f32 %v1341_v35, 0.0  ;;  %v1553_v42 = vmax.f32 %v1521_v3, 0.0  ;;  %v1912_v25 = vmax.f32 %v1880_v2, 0.0  ;;  %v927_v38 = vsel %vm894_vm3, %v926_v32, %v925_v20 }
 0x26f   :  { %v1107_v41 = vsel %vm894_vm3, %v1106_v48, %v1105_v17  ;;  %v1286_v59 = vrot.slane %v1193_v18, 7  ;;  %v2092_v26 = vmax.f32 %v2060_v19, 0.0  ;;  %v1881_v22 = vadd.f32 %v3738_v46, %v3749_v10 }
 0x270   :  { %v1467_v29 = vsel %vm894_vm3, %v1373_v56, %v1466_v30  ;;  %v1647_v21 = vrot.slane %v1553_v42, 1  ;;  %v1733_v52 = vmax.f32 %v1701_v0, 0.0  ;;  %v787_v61 = vadd.f32 %v3735_v43, %v3784_v6 }
 0x271   :  { %v1287_v44 = vsel %vm894_vm3, %v1286_v59, %v1285_v23  ;;  %v982_v1 = vadd.f32 %v3732_v60, %v3784_v6  ;;  %v2061_v39 = vadd.f32 %v3735_v43, %v3749_v10  ;;  %v1162_v11 = vadd.f32 %v3760_v45, %v3784_v6 }
 0x272   :  { %v3857_v63 = vsel %vm894_vm3, %v1647_v21, %v1646_v33  ;;  %v1342_v4 = vadd.f32 %v3770_v9, %v3784_v6  ;;  %v3865_v31 = vrot.slane %v2090_v8, 7  ;;  %v3867_v20 = vrot.slane %v2091_v53, 6 }
 0x273   :  { %v819_v5 = vmax.f32 %v787_v61, 0.0  ;;  %v1014_v23 = vmax.f32 %v982_v1, 0.0  ;;  %v3869_v51 = vrot.slane %v1912_v25, 4  ;;  %v3871_v16 = vrot.slane %v2092_v26, 5  ;;  %v3873_v17 = vpop.f32.mrf.mxu2 }
 0x274   :  { %v1194_v37 = vmax.f32 %v1162_v11, 0.0  ;;  %v1374_v12 = vmax.f32 %v1342_v4, 0.0  ;;  %4489 = vst [vmem:[#allocation15_spill] sm:$0xff] %v3873_v17  ;;  %v3875_v10 = vrot.slane %v1733_v52, 2  ;;  %v1913_v55 = vmax.f32 %v1881_v22, 0.0 }
 0x275   :  { %4488 = vst [vmem:[#allocation11_spill] sm:$0xff] %v3871_v16  ;;  %v928_v7 = vrot.slane %v819_v5, 4  ;;  %v1108_v14 = vrot.slane %v1014_v23, 5  ;;  %v2093_v30 = vmax.f32 %v2061_v39, 0.0  ;;  %v3879_v2 = vadd.f32 %v3722_v34, %v3784_v6 }
 0x276   :  { %v1288_v33 = vrot.slane %v1194_v37, 6  ;;  %v1468_v13 = vrot.slane %v1374_v12, 7  ;;  %v1702_v50 = vadd.f32 %v3745_v24, %v3784_v6  ;;  %v788_v19 = vadd.f32 %v3738_v46, %v3809_v27 }
 0x277   :  { %v929_v15 = vsel %vm897_vm6, %v928_v7, %v927_v38  ;;  %v1109_v58 = vsel %vm897_vm6, %v1108_v14, %v1107_v41  ;;  %v1882_v32 = vadd.f32 %v3742_v28, %v3784_v6  ;;  %v2062_v48 = vadd.f32 %v3738_v46, %v3784_v6 }
 0x278   :  { %v1289_v35 = vsel %vm897_vm6, %v1288_v33, %v1287_v44  ;;  %v3889_v3 = vsel %vm897_vm6, %v1468_v13, %v1467_v29  ;;  %v3895_v18 = vrot.slane %v1913_v55, 3  ;;  %v820_v0 = vmax.f32 %v788_v19, 0.0 }
 0x279   :  { %v983_v8 = vadd.f32 %v3735_v43, %v3809_v27  ;;  %v1163_v53 = vadd.f32 %v3732_v60, %v3809_v27  ;;  %v3901_v56 = vrot.slane %v2093_v30, 4  ;;  %v1343_v25 = vadd.f32 %v3760_v45, %v3809_v27 }
 0x27a   :  { %v1523_v38 = vadd.f32 %v3770_v9, %v3809_v27  ;;  %v1734_v6 = vmax.f32 %v1702_v50, 0.0  ;;  %v930_v41 = vrot.slane %v820_v0, 3  ;;  %v1914_v29 = vmax.f32 %v1882_v32, 0.0 }
 0x27b   :  { %4490 = vst [vmem:[#allocation17_spill] sm:$0xff] %v3901_v56  ;;  %v1015_v59 = vmax.f32 %v983_v8, 0.0  ;;  %v1195_v26 = vmax.f32 %v1163_v53, 0.0  ;;  %v2094_v21 = vmax.f32 %v2062_v48, 0.0  ;;  %v3910_v22 = vadd.f32 %v3722_v34, %v3809_v27  ;;  %v3914_v52 = vpop.f32.mrf.mxu2 }
 0x27c   :  { %v1883_v44 = vadd.f32 %v3745_v24, %v3809_v27  ;;  %v931_v61 = vsel %vm900_vm8, %v930_v41, %v929_v15  ;;  %v3919_v11 = vadd.f32 %v3742_v28, %v3809_v27  ;;  %v1375_v4 = vmax.f32 %v1343_v25, 0.0 }
 0x27d   :  { %v1110_v1 = vrot.slane %v1015_v59, 4  ;;  %v1290_v39 = vrot.slane %v1195_v26, 5  ;;  %v1555_v5 = vmax.f32 %v1523_v38, 0.0  ;;  %v789_v23 = vadd.f32 %v3742_v28, %v3842_v49 }
 0x27e   :  { %4491 = vst [vmem:[#allocation20_spill] sm:$0xff] %v3919_v11  ;;  %v984_v37 = vadd.f32 %v3738_v46, %v3842_v49  ;;  %v1164_v7 = vadd.f32 %v3735_v43, %v3842_v49  ;;  %v1344_v27 = vadd.f32 %v3732_v60, %v3842_v49  ;;  %v1915_v14 = vmax.f32 %v1883_v44, 0.0 }
 0x27f   :  { %v1111_v12 = vsel %vm900_vm8, %v1110_v1, %v1109_v58  ;;  %v3927_v55 = vsel %vm900_vm8, %v1290_v39, %v1289_v35  ;;  %v821_v30 = vmax.f32 %v789_v23, 0.0  ;;  %v1524_v13 = vadd.f32 %v3760_v45, %v3842_v49 }
 0x280   :  { %4492 = vst [vmem:[#allocation24_spill] sm:$0xff] %v3927_v55  ;;  %v1016_v33 = vmax.f32 %v984_v37, 0.0  ;;  %v3935_v15 = vrot.slane %v1734_v6, 1  ;;  %v3937_v50 = vrot.slane %v1914_v29, 2  ;;  %v3939_v58 = vrot.slane %v2094_v21, 3 }
 0x281   :  { %v1704_v19 = vadd.f32 %v3770_v9, %v3842_v49  ;;  %v1196_v32 = vmax.f32 %v1164_v7, 0.0  ;;  %v1376_v48 = vmax.f32 %v1344_v27, 0.0  ;;  %v790_v0 = vadd.f32 %v3745_v24, %v3873_v17 }
 0x282   :  { %4493 = vst [vmem:[#allocation25_spill] sm:$0xff] %v3939_v58  ;;  %v932_v8 = vrot.slane %v821_v30, 2  ;;  %v1112_v53 = vrot.slane %v1016_v33, 3  ;;  %v1556_v25 = vmax.f32 %v1524_v13, 0.0  ;;  %v985_v38 = vadd.f32 %v3742_v28, %v3873_v17 }
 0x283   :  { %v3948_v6 = vrot.slane %v1375_v4, 6  ;;  %v3950_v41 = vrot.slane %v1555_v5, 7  ;;  %v3952_v59 = vrot.slane %v1915_v14, 1  ;;  %v598_v29 = vpop.f32.mrf.mxu2  ;;  %v1736_v21 = vmax.f32 %v1704_v19, 0.0 }
 0x284   :  { %v3957_v44 = vadd.f32 %v3722_v34, %v3842_v49  ;;  %v1165_v1 = vadd.f32 %v3738_v46, %v3873_v17  ;;  %v1345_v28 = vadd.f32 %v3735_v43, %v3873_v17  ;;  %v3963_v39 = vrot.slane %v1196_v32, 4 }
 0x285   :  { %4494 = vst [vmem:[#allocation26_spill] sm:$0xff] %v3952_v59  ;;  %v3965_v4 = vrot.slane %v1376_v48, 5  ;;  %v822_v5 = vmax.f32 %v790_v0, 0.0  ;;  %v1525_v23 = vadd.f32 %v3732_v60, %v3873_v17  ;;  %v3970_v37 = vsel %vm903_vm7, %v932_v8, %v931_v61 }
 0x286   :  { %4495 = vst [vmem:[#allocation19_spill] sm:$0xff] %v3963_v39  ;;  %v3973_v7 = vsel %vm903_vm7, %v1112_v53, %v1111_v12  ;;  %v3975_v27 = vrot.slane %v1556_v25, 6  ;;  %v1017_v46 = vmax.f32 %v985_v38, 0.0  ;;  %v1197_v14 = vmax.f32 %v1165_v1, 0.0 }
 0x287   :  { %4496 = vst [vmem:[#allocation27_spill] sm:$0xff] %v3965_v4  ;;  %v1377_v30 = vmax.f32 %v1345_v28, 0.0  ;;  %v3979_v43 = vadd.f32 %v3760_v45, %v3873_v17  ;;  %v3982_v33 = vrot.slane %v3816_v62, 5  ;;  %v3985_v60 = vrot.slane %v3816_v62, 3 }
 0x288   :  { %4497 = vst [vmem:[#allocation33_spill] sm:$0xff] %v3970_v37  ;;  %v3988_v61 = vrot.slane %v3816_v62, 4  ;;  %v3991_v12 = vrot.slane %v3816_v62, 6  ;;  %v3994_v13 = vrot.slane %v3816_v62, 7  ;;  %v1557_v19 = vmax.f32 %v1525_v23, 0.0 }
 0x289   :  { %4498 = vst [vmem:[#allocation34_spill] sm:$0xff] %v3973_v7  ;;  %v3997_v32 = vrot.slane %v3816_v62, 1  ;;  %v4000_v45 = vrot.slane %v3816_v62, 2  ;;  %v1346_v48 = vadd.f32 %v3982_v33, %v3914_v52  ;;  %v1706_v25 = vadd.f32 %v3985_v60, %v3914_v52 }
 0x28a   :  { %4499 = vst [vmem:[#allocation35_spill] sm:$0xff] %v3975_v27  ;;  %v986_v0 = vadd.f32 %v3994_v13, %v3914_v52  ;;  %v1166_v8 = vadd.f32 %v3991_v12, %v3914_v52  ;;  %v1526_v53 = vadd.f32 %v3988_v61, %v3914_v52  ;;  %v4012_v38 = vrot.slane %v1736_v21, 7 }
 0x28b   :  { %4500 = vst [vmem:[#allocation36_spill] sm:$0xff] %v3979_v43  ;;  %v4014_v1 = vrot.slane %v822_v5, 1  ;;  %v1886_v28 = vadd.f32 %v4000_v45, %v3914_v52  ;;  %v2066_v23 = vadd.f32 %v3997_v32, %v3914_v52  ;;  %v601_v26 = vpop.f32.mrf.mxu2  ;;  %v4020_v35 = vrot.slane %v1017_v46, 2 }
 0x28c   :  { %4501 = vst [vmem:[#allocation37_spill] sm:$0xff] %v3994_v13  ;;  %v4022_v42 = vrot.slane %v1197_v14, 3  ;;  %v4024_v47 = vrot.slane %v1377_v30, 4  ;;  %v4027_v36 = vrot.slane %v1557_v19, 5  ;;  %v791_v21 = vadd.f32 %v3816_v62, %v3914_v52 }
 0x28d   :  { %4502 = vst [vmem:[#allocation38_spill] sm:$0xff] %v4012_v38  ;;  %v1378_v5 = vmax.f32 %v1346_v48, 0.0  ;;  %v792_v7 = vadd.f32 %v3997_v32, %v598_v29  ;;  %v1198_v37 = vmax.f32 %v1166_v8, 0.0  ;;  %v1558_v34 = vmax.f32 %v1526_v53, 0.0 }
 0x28e   :  { %4503 = vst [vmem:[#allocation39_spill] sm:$0xff] %v4014_v1  ;;  %v1018_v1 = vmax.f32 %v986_v0, 0.0  ;;  %v1738_v9 = vmax.f32 %v1706_v25, 0.0  ;;  %v1918_v46 = vmax.f32 %v1886_v28, 0.0  ;;  %v1167_v30 = vadd.f32 %v3994_v13, %v598_v29 }
 0x28f   :  { %4504 = vst [vmem:[#allocation40_spill] sm:$0xff] %v4020_v35  ;;  %v2098_v35 = vmax.f32 %v2066_v23, 0.0  ;;  %v824_v14 = vmax.f32 %v792_v7, 0.0  ;;  %v1347_v19 = vadd.f32 %v3991_v12, %v598_v29  ;;  %v1527_v54 = vadd.f32 %v3982_v33, %v598_v29 }
 0x290   :  { %4505 = vst [vmem:[#allocation41_spill] sm:$0xff] %v4022_v42  ;;  %v1707_v52 = vadd.f32 %v3988_v61, %v598_v29  ;;  %v823_v48 = vmax.f32 %v791_v21, 0.0  ;;  %v1476_v43 = vrot.slane %v1378_v5, 3  ;;  %v1887_v0 = vadd.f32 %v3985_v60, %v598_v29 }
 0x291   :  { %4506 = vst [vmem:[#allocation42_spill] sm:$0xff] %v4024_v47  ;;  %v987_v47 = vadd.f32 %v3816_v62, %v598_v29  ;;  %v1379_v8 = vmax.f32 %v1347_v19, 0.0  ;;  %v1559_v53 = vmax.f32 %v1527_v54, 0.0  ;;  %v2067_v7 = vadd.f32 %v4000_v45, %v598_v29 }
 0x292   :  { %4507 = vst [vmem:[#allocation43_spill] sm:$0xff] %v4027_v36  ;;  %v1199_v36 = vmax.f32 %v1167_v30, 0.0  ;;  %v1739_v25 = vmax.f32 %v1707_v52, 0.0  ;;  %v1116_v28 = vrot.slane %v1018_v1, 1  ;;  %v1296_v23 = vrot.slane %v1198_v37, 2 }
 0x293   :  { %v1656_v42 = vrot.slane %v1558_v34, 4  ;;  %v1836_v17 = vrot.slane %v1738_v9, 5  ;;  %v4039_v38 = vpop.f32.mrf.mxu2  ;;  %v2016_v27 = vrot.slane %v1918_v46, 6  ;;  %v4041_v4 = vrot.slane %v2098_v35, 7 }
 0x294   :  { %v936_v39 = vrot.slane %v824_v14, 7  ;;  %v1019_v21 = vmax.f32 %v987_v47, 0.0  ;;  %v1297_v5 = vrot.slane %v1199_v36, 1  ;;  %v1919_v30 = vmax.f32 %v1887_v0, 0.0 }
 0x295   :  { %4508 = vst [vmem:[#allocation44_spill] sm:$0xff] %v4041_v4  ;;  %v793_v55 = vadd.f32 %v4000_v45, %v601_v26  ;;  %v988_v54 = vadd.f32 %v3997_v32, %v601_v26  ;;  %v1477_v19 = vrot.slane %v1379_v8, 2  ;;  %v1657_v52 = vrot.slane %v1559_v53, 3 }
 0x296   :  { %v1837_v29 = vrot.slane %v1739_v25, 4  ;;  %v2099_v1 = vmax.f32 %v2067_v7, 0.0  ;;  %v1168_v9 = vadd.f32 %v3816_v62, %v601_v26  ;;  %v1348_v46 = vadd.f32 %v3994_v13, %v601_v26 }
 0x297   :  { %v825_v37 = vmax.f32 %v793_v55, 0.0  ;;  %v1020_v34 = vmax.f32 %v988_v54, 0.0  ;;  %v1528_v35 = vadd.f32 %v3991_v12, %v601_v26  ;;  %v1708_v47 = vadd.f32 %v3982_v33, %v601_v26 }
 0x298   :  { %v1888_v36 = vadd.f32 %v3988_v61, %v601_v26  ;;  %v2068_v14 = vadd.f32 %v3985_v60, %v601_v26  ;;  %v937_v0 = vsel %vm4429_vm9, %v936_v39, %v823_v48  ;;  %v1117_v8 = vsel %vm4429_vm9, %v1019_v21, %v1116_v28 }
 0x299   :  { %v2017_v53 = vrot.slane %v1919_v30, 5  ;;  %v1380_v25 = vmax.f32 %v1348_v46, 0.0  ;;  %v1298_v55 = vsel %vm4429_vm9, %v1297_v5, %v1296_v23  ;;  %v4054_v7 = vrot.slane %v2099_v1, 6 }
 0x29a   :  { %v1560_v54 = vmax.f32 %v1528_v35, 0.0  ;;  %v1740_v4 = vmax.f32 %v1708_v47, 0.0  ;;  %v1478_v58 = vsel %vm4429_vm9, %v1477_v19, %v1476_v43  ;;  %v1658_v56 = vsel %vm4429_vm9, %v1657_v52, %v1656_v42 }
 0x29b   :  { %4509 = vst [vmem:[#allocation45_spill] sm:$0xff] %v4054_v7  ;;  %v1838_v59 = vsel %vm4429_vm9, %v1837_v29, %v1836_v17  ;;  %v938_v11 = vrot.slane %v825_v37, 6  ;;  %v606_v26 = vpop.f32.mrf.mxu2  ;;  %v1118_v16 = vrot.slane %v1020_v34, 7  ;;  %v1200_v39 = vmax.f32 %v1168_v9, 0.0 }
 0x29c   :  { %v1920_v48 = vmax.f32 %v1888_v36, 0.0  ;;  %v2100_v28 = vmax.f32 %v2068_v14, 0.0  ;;  %v1479_v21 = vrot.slane %v1380_v25, 1  ;;  %v794_v23 = vadd.f32 %v3985_v60, %v4039_v38 }
 0x29d   :  { %v989_v5 = vadd.f32 %v4000_v45, %v4039_v38  ;;  %v1169_v43 = vadd.f32 %v3997_v32, %v4039_v38  ;;  %v1659_v30 = vrot.slane %v1560_v54, 2  ;;  %v1839_v42 = vrot.slane %v1740_v4, 3 }
 0x29e   :  { %v1349_v17 = vadd.f32 %v3816_v62, %v4039_v38  ;;  %v1529_v19 = vadd.f32 %v3994_v13, %v4039_v38  ;;  %v4070_v52 = vsel %vm4429_vm9, %v2017_v53, %v2016_v27  ;;  %v826_v29 = vmax.f32 %v794_v23, 0.0 }
 0x29f   :  { %4510 = vst [vmem:[#allocation46_spill] sm:$0xff] %v4070_v52  ;;  %v1021_v1 = vmax.f32 %v989_v5, 0.0  ;;  %v1201_v37 = vmax.f32 %v1169_v43, 0.0  ;;  %v939_v34 = vsel %vm4430_vm2, %v938_v11, %v937_v0  ;;  %v1709_v35 = vadd.f32 %v3991_v12, %v4039_v38 }
 0x2a0   :  { %v1381_v9 = vmax.f32 %v1349_v17, 0.0  ;;  %v1561_v46 = vmax.f32 %v1529_v19, 0.0  ;;  %v1119_v4 = vsel %vm4430_vm2, %v1118_v16, %v1117_v8  ;;  %v1299_v47 = vsel %vm4430_vm2, %v1200_v39, %v1298_v55 }
 0x2a1   :  { %v4077_v36 = vrot.slane %v1920_v48, 4  ;;  %v1889_v27 = vadd.f32 %v3982_v33, %v4039_v38  ;;  %v1480_v14 = vsel %vm4430_vm2, %v1479_v21, %v1478_v58  ;;  %v1660_v53 = vsel %vm4430_vm2, %v1659_v30, %v1658_v56 }
 0x2a2   :  { %v4084_v11 = vsel %vm4430_vm2, %v1839_v42, %v1838_v59  ;;  %v4086_v0 = vrot.slane %v2100_v28, 5  ;;  %v940_v25 = vrot.slane %v826_v29, 5  ;;  %v1120_v54 = vrot.slane %v1021_v1, 6 }
 0x2a3   :  { %4511 = vst [vmem:[#allocation47_spill] sm:$0xff] %v4077_v36  ;;  %v1300_v23 = vrot.slane %v1201_v37, 7  ;;  %v2069_v16 = vadd.f32 %v3988_v61, %v4039_v38  ;;  %v608_v8 = vpop.f32.mrf.mxu2  ;;  %v1481_v55 = vsel %vm894_vm3, %v1381_v9, %v1480_v14  ;;  %v1661_v39 = vrot.slane %v1561_v46, 1 }
 0x2a4   :  { %4512 = vst [vmem:[#allocation48_spill] sm:$0xff] %v4086_v0  ;;  %v1741_v48 = vmax.f32 %v1709_v35, 0.0  ;;  %v795_v58 = vadd.f32 %v3988_v61, %v606_v26  ;;  %v1921_v21 = vmax.f32 %v1889_v27, 0.0  ;;  %v990_v56 = vadd.f32 %v3985_v60, %v606_v26 }
 0x2a5   :  { %v1170_v59 = vadd.f32 %v4000_v45, %v606_v26  ;;  %v1350_v28 = vadd.f32 %v3997_v32, %v606_v26  ;;  %v1710_v43 = vadd.f32 %v3994_v13, %v606_v26  ;;  %v1890_v30 = vadd.f32 %v3991_v12, %v606_v26 }
 0x2a6   :  { %v827_v5 = vmax.f32 %v795_v58, 0.0  ;;  %v2070_v38 = vadd.f32 %v3982_v33, %v606_v26  ;;  %v941_v42 = vsel %vm894_vm3, %v940_v25, %v939_v34  ;;  %v2101_v17 = vmax.f32 %v2069_v16, 0.0 }
 0x2a7   :  { %v1022_v19 = vmax.f32 %v990_v56, 0.0  ;;  %v1202_v29 = vmax.f32 %v1170_v59, 0.0  ;;  %v1121_v1 = vsel %vm894_vm3, %v1120_v54, %v1119_v4  ;;  %v1301_v37 = vsel %vm894_vm3, %v1300_v23, %v1299_v47 }
 0x2a8   :  { %v4102_v9 = vsel %vm894_vm3, %v1661_v39, %v1660_v53  ;;  %v4104_v46 = vrot.slane %v1741_v48, 2  ;;  %v942_v35 = vrot.slane %v827_v5, 4  ;;  %v1382_v27 = vmax.f32 %v1350_v28, 0.0 }
 0x2a9   :  { %v4107_v14 = vadd.f32 %v3816_v62, %v606_v26  ;;  %v796_v58 = vadd.f32 %v3982_v33, %v608_v8  ;;  %v4110_v34 = vrot.slane %v1921_v21, 3  ;;  %v1742_v25 = vmax.f32 %v1710_v43, 0.0 }
 0x2aa   :  { %v1922_v16 = vmax.f32 %v1890_v30, 0.0  ;;  %v2102_v56 = vmax.f32 %v2070_v38, 0.0  ;;  %v4112_v4 = vrot.slane %v2101_v17, 4  ;;  %v1122_v47 = vrot.slane %v1022_v19, 5 }
 0x2ab   :  { %4513 = vst [vmem:[#allocation49_spill] sm:$0xff] %v4110_v34  ;;  %v1302_v54 = vrot.slane %v1202_v29, 6  ;;  %v828_v53 = vmax.f32 %v796_v58, 0.0  ;;  %v4114_v23 = vpop.f32.mrf.mxu2  ;;  %v991_v39 = vadd.f32 %v3988_v61, %v608_v8  ;;  %v1171_v48 = vadd.f32 %v3985_v60, %v608_v8 }
 0x2ac   :  { %4514 = vst [vmem:[#allocation50_spill] sm:$0xff] %v4112_v4  ;;  %v1351_v26 = vadd.f32 %v4000_v45, %v608_v8  ;;  %v1531_v59 = vadd.f32 %v3997_v32, %v608_v8  ;;  %v943_v21 = vsel %vm897_vm6, %v942_v35, %v941_v42  ;;  %v1482_v28 = vrot.slane %v1382_v27, 7 }
 0x2ad   :  { %v1891_v43 = vadd.f32 %v3994_v13, %v608_v8  ;;  %v4123_v30 = vrot.slane %v1742_v25, 1  ;;  %v4125_v38 = vrot.slane %v1922_v16, 2  ;;  %v4127_v17 = vrot.slane %v2102_v56, 3 }
 0x2ae   :  { %v944_v19 = vrot.slane %v828_v53, 3  ;;  %v1123_v29 = vsel %vm897_vm6, %v1122_v47, %v1121_v1  ;;  %v1303_v58 = vsel %vm897_vm6, %v1302_v54, %v1301_v37  ;;  %v4132_v4 = vadd.f32 %v3816_v62, %v608_v8 }
 0x2af   :  { %4515 = vst [vmem:[#allocation51_spill] sm:$0xff] %v4125_v38  ;;  %v4135_v42 = vadd.f32 %v3991_v12, %v608_v8  ;;  %v1023_v35 = vmax.f32 %v991_v39, 0.0  ;;  %v1203_v27 = vmax.f32 %v1171_v48, 0.0  ;;  %v1383_v5 = vmax.f32 %v1351_v26, 0.0 }
 0x2b0   :  { %4516 = vst [vmem:[#allocation52_spill] sm:$0xff] %v4127_v17  ;;  %v1563_v25 = vmax.f32 %v1531_v59, 0.0  ;;  %v1923_v0 = vmax.f32 %v1891_v43, 0.0  ;;  %v797_v16 = vadd.f32 %v3991_v12, %v4114_v23  ;;  %v992_v56 = vadd.f32 %v3982_v33, %v4114_v23 }
 0x2b1   :  { %4517 = vst [vmem:[#allocation53_spill] sm:$0xff] %v4135_v42  ;;  %v1172_v1 = vadd.f32 %v3988_v61, %v4114_v23  ;;  %v4144_v37 = vsel %vm897_vm6, %v1482_v28, %v1481_v55  ;;  %v945_v8 = vsel %vm900_vm8, %v944_v19, %v943_v21  ;;  %v1352_v47 = vadd.f32 %v3985_v60, %v4114_v23 }
 0x2b2   :  { %v1532_v54 = vadd.f32 %v4000_v45, %v4114_v23  ;;  %v829_v39 = vmax.f32 %v797_v16, 0.0  ;;  %v1024_v48 = vmax.f32 %v992_v56, 0.0  ;;  %v1712_v26 = vadd.f32 %v3997_v32, %v4114_v23 }
 0x2b3   :  { %v613_v59 = vpop.f32.mrf.mxu2  ;;  %v1124_v43 = vrot.slane %v1023_v35, 4  ;;  %v1204_v28 = vmax.f32 %v1172_v1, 0.0  ;;  %v1304_v19 = vrot.slane %v1203_v27, 5  ;;  %v4156_v17 = vrot.slane %v1383_v5, 6  ;;  %v4518_v27 = vld [vmem:[#allocation8_spill] sm:$0xff] }
 0x2b4   :  { %v798_v21 = vadd.f32 %v3994_v13, %v613_v59  ;;  %v4158_v7 = vrot.slane %v1563_v25, 7  ;;  %v4160_v38 = vrot.slane %v1923_v0, 1  ;;  %v1384_v53 = vmax.f32 %v1352_v47, 0.0 }
 0x2b5   :  { %v1564_v16 = vmax.f32 %v1532_v54, 0.0  ;;  %v993_v34 = vadd.f32 %v3991_v12, %v613_v59  ;;  %v946_v36 = vrot.slane %v829_v39, 2  ;;  %v1126_v52 = vrot.slane %v1024_v48, 3  ;;  %v4519_v12 = vld [vmem:[#allocation6_spill] sm:$0xff] }
 0x2b6   :  { %v830_v56 = vmax.f32 %v798_v21, 0.0  ;;  %v1744_v35 = vmax.f32 %v1712_v26, 0.0  ;;  %v1173_v55 = vadd.f32 %v3982_v33, %v613_v59  ;;  %v1306_v1 = vrot.slane %v1204_v28, 4  ;;  %v4520_v28 = vld [vmem:[#allocation7_spill] sm:$0xff] }
 0x2b7   :  { %v1025_v13 = vmax.f32 %v993_v34, 0.0  ;;  %v1353_v5 = vadd.f32 %v3988_v61, %v613_v59  ;;  %vm854_vm4 = vcmp.eq.s32.totalorder %v4518_v27, 1  ;;  %v1125_v0 = vsel %vm900_vm8, %v1124_v43, %v1123_v29 }
 0x2b8   :  { %v948_v42 = vrot.slane %v830_v56, 1  ;;  %v1205_v25 = vmax.f32 %v1173_v55, 0.0  ;;  %v1533_v47 = vadd.f32 %v3985_v60, %v613_v59  ;;  %v1713_v54 = vadd.f32 %v4000_v45, %v613_v59  ;;  %v4523_v56 = vld [vmem:[#allocation12_spill] sm:$0xff] }
 0x2b9   :  { %vm1041_vm1 = vcmp.eq.s32.totalorder %v4519_v12, 1  ;;  %v1305_v39 = vsel %vm900_vm8, %v1304_v19, %v1303_v58  ;;  %v4173_v33 = vadd.f32 %v3816_v62, %v4114_v23  ;;  %v1128_v34 = vrot.slane %v1025_v13, 2  ;;  %v4539_v12 = vld [vmem:[#allocation27_spill] sm:$0xff] }
 0x2ba   :  { %v1893_v61 = vadd.f32 %v3997_v32, %v613_v59  ;;  %v4176_v48 = vrot.slane %v1384_v53, 5  ;;  %v4178_v26 = vrot.slane %v1564_v16, 6  ;;  %v4180_v29 = vrot.slane %v1744_v35, 7  ;;  %v4524_v35 = vld [vmem:[#allocation10_spill] sm:$0xff] }
 0x2bb   :  { %v947_v60 = vsel %vm903_vm7, %v946_v36, %v945_v8  ;;  %v1127_v43 = vsel %vm903_vm7, %v1126_v52, %v1125_v0  ;;  %v1307_v58 = vsel %vm903_vm7, %v1306_v1, %v1305_v39  ;;  %v1385_v55 = vmax.f32 %v1353_v5, 0.0  ;;  %v4522_v8 = vld [vmem:[#allocation9_spill] sm:$0xff]  ;;  %v4527_v0 = vld [vmem:[#allocation14_spill] sm:$0xff] }
 0x2bc   :  { %v949_v45 = vsel %vm906_vm10, %v948_v42, %v947_v60  ;;  %vm853_vm11 = vcmp.eq.s32.totalorder %v4520_v28, 1  ;;  %v1129_v13 = vsel %vm906_vm10, %v1128_v34, %v1127_v43  ;;  %v1308_v32 = vrot.slane %v1205_v25, 3  ;;  %v4534_v39 = vld [vmem:[#allocation13_spill] sm:$0xff] }
 0x2bd   :  { %v1565_v53 = vmax.f32 %v1533_v47, 0.0  ;;  %v1745_v21 = vmax.f32 %v1713_v54, 0.0  ;;  %v1925_v19 = vmax.f32 %v1893_v61, 0.0  ;;  %v1471_v16 = vsel %vm900_vm8, %v3948_v6, %v3889_v3  ;;  %v4531_v47 = vld [vmem:[#allocation26_spill] sm:$0xff]  ;;  %v4532_v54 = vld [vmem:[#allocation17_spill] sm:$0xff] }
 0x2be   :  { %v4521_v36 = vmax.f32 %v3879_v2, 0.0  ;;  %v1828_v42 = vsel %vm894_vm3, %v3875_v10, %v3834_v40  ;;  %vm1040_vm13 = vcmp.eq.s32.totalorder %v4522_v8, 1  ;;  %vm1221_vm12 = vcmp.eq.s32.totalorder %v4523_v56, 1  ;;  %v4525_v40 = vld [vmem:[#allocation21_spill] sm:$0xff] }
 0x2bf   :  { %vm1220_vm14 = vcmp.eq.s32.totalorder %v4524_v35, 1  ;;  %v1830_v3 = vsel %vm897_vm6, %v3935_v15, %v1828_v42  ;;  %v2064_v2 = vadd.f32 %v3745_v24, %v3842_v49  ;;  %vm1580_vm5 = vcmp.eq.s32.totalorder %v4525_v40, 1  ;;  %v4528_v49 = vld [vmem:[#allocation11_spill] sm:$0xff]  ;;  %v4535_v60 = vld [vmem:[#allocation25_spill] sm:$0xff] }
 0x2c0   :  { %v1649_v52 = vsel %vm897_vm6, %v4521_v36, %v3857_v63  ;;  %v2006_v63 = vsel %vm4430_vm2, %v3869_v51, %v3803_v57  ;;  %v4526_v10 = vmax.f32 %v3910_v22, 0.0  ;;  %v1916_v5 = vmax.f32 %v3957_v44, 0.0  ;;  %v4529_v22 = vld [vmem:[#allocation20_spill] sm:$0xff]  ;;  %v4553_v35 = vld [vmem:[#allocation43_spill] sm:$0xff] }
 0x2c1   :  { %v1651_v1 = vsel %vm900_vm8, %v3950_v41, %v1649_v52  ;;  %v2008_v41 = vsel %vm894_vm3, %v3895_v18, %v2006_v63  ;;  %v2184_v15 = vsel %vm4429_vm9, %v3867_v20, %v3865_v31  ;;  %vm1400_vm15 = vcmp.eq.s32.totalorder %v4527_v0, 1  ;;  %v4538_v63 = vld [vmem:[#allocation19_spill] sm:$0xff] }
 0x2c2   :  { %v1831_v6 = vsel %vm900_vm8, %v4526_v10, %v1830_v3  ;;  %v4222_v57 = vadd.f32 %v3816_v62, %v613_v59  ;;  %v2010_v24 = vsel %vm897_vm6, %v3937_v50, %v2008_v41  ;;  %v2186_v51 = vsel %vm4430_vm2, %v4528_v49, %v2184_v15  ;;  %v4533_v59 = vld [vmem:[#allocation16_spill] sm:$0xff]  ;;  %v4541_v10 = vld [vmem:[#allocation38_spill] sm:$0xff]  ;;  %v4545_v49 = vld [vmem:[#allocation33_spill] sm:$0xff] }
 0x2c3   :  { %v4530_v44 = vmax.f32 %v4529_v22, 0.0  ;;  %v957_v18 = vsel %vm854_vm4, %v949_v45, 0.0  ;;  %v2012_v31 = vsel %vm900_vm8, %v4531_v47, %v2010_v24  ;;  %v2096_v20 = vmax.f32 %v2064_v2, 0.0  ;;  %v4536_v45 = vld [vmem:[#allocation28_spill] sm:$0xff]  ;;  %v4547_v22 = vld [vmem:[#allocation34_spill] sm:$0xff]  ;;  %v4549_v47 = vld [vmem:[#allocation41_spill] sm:$0xff] }
 0x2c4   :  { %v2188_v62 = vsel %vm894_vm3, %v4532_v54, %v2186_v51  ;;  %vm1401_vm0 = vcmp.eq.s32.totalorder %v4533_v59, 1  ;;  %vm1581_vm9 = vcmp.eq.s32.totalorder %v4534_v39, 1  ;;  %v1137_v50 = vsel %vm1041_vm1, %v1129_v13, 0.0  ;;  %v4537_v3 = vld [vmem:[#allocation24_spill] sm:$0xff]  ;;  %v4546_v51 = vld [vmem:[#allocation39_spill] sm:$0xff]  ;;  %v4551_v54 = vld [vmem:[#allocation30_spill] sm:$0xff] }
 0x2c5   :  { %v2191_v25 = vrot.slane %v4530_v44, 2  ;;  %v1309_v34 = vsel %vm906_vm10, %v1308_v32, %v1307_v58  ;;  %v1488_v61 = vrot.slane %v1385_v55, 4  ;;  %v2190_v27 = vsel %vm897_vm6, %v4535_v60, %v2188_v62  ;;  %v4540_v58 = vld [vmem:[#allocation35_spill] sm:$0xff] }
 0x2c6   :  { %vm1760_vm4 = vcmp.eq.s32.totalorder %v4536_v45, 1  ;;  %v1668_v43 = vrot.slane %v1565_v53, 5  ;;  %v1848_v36 = vrot.slane %v1745_v21, 6  ;;  %v4244_v52 = vrot.slane %v1925_v19, 7  ;;  %v4542_v21 = vld [vmem:[#allocation15_spill] sm:$0xff] }
 0x2c7   :  { %v2013_v42 = vsel %vm903_vm7, %v1916_v5, %v2012_v31  ;;  %v1293_v2 = vsel %vm903_vm7, %v4538_v63, %v4537_v3  ;;  %v1473_v13 = vsel %vm903_vm7, %v4539_v12, %v1471_v16  ;;  %v1653_v55 = vsel %vm903_vm7, %v4540_v58, %v1651_v1  ;;  %v4543_v19 = vld [vmem:[#allocation23_spill] sm:$0xff]  ;;  %v4544_v5 = vld [vmem:[#allocation22_spill] sm:$0xff]  ;;  %v4548_v1 = vld [vmem:[#allocation40_spill] sm:$0xff] }
 0x2c8   :  { %v4255_v32 = vsel %vm900_vm8, %v2191_v25, %v2190_v27  ;;  %v1833_v53 = vsel %vm903_vm7, %v4541_v10, %v1831_v6  ;;  %v1885_v41 = vadd.f32 %v4543_v19, %v4542_v21  ;;  %v4263_v15 = vadd.f32 %v4544_v5, %v4542_v21  ;;  %v4550_v31 = vld [vmem:[#allocation29_spill] sm:$0xff]  ;;  %v4552_v3 = vld [vmem:[#allocation42_spill] sm:$0xff]  ;;  %v4555_v58 = vld [vmem:[#allocation32_spill] sm:$0xff] }
 0x2c9   :  { %v2193_v24 = vrot.slane %v2096_v20, 1  ;;  %v935_v16 = vsel %vm906_vm10, %v4546_v51, %v4545_v49  ;;  %v1115_v44 = vsel %vm906_vm10, %v4548_v1, %v4547_v22  ;;  %v1141_v25 = vadd.f32 %v1137_v50, %v957_v18 }
 0x2ca   :  { %v1295_v6 = vsel %vm906_vm10, %v4549_v47, %v1293_v2  ;;  %vm1761_vm1 = vcmp.eq.s32.totalorder %v4550_v31, 1  ;;  %vm1940_vm2 = vcmp.eq.s32.totalorder %v4551_v54, 1  ;;  %v956_v62 = vsel %vm853_vm11, %v935_v16, 0.0  ;;  %v4563_v47 = vld [vmem:[#allocation49_spill] sm:$0xff]  ;;  %v4569_v54 = vld [vmem:[#allocation48_spill] sm:$0xff] }
 0x2cb   :  { %v1136_v20 = vsel %vm1040_vm13, %v1115_v44, 0.0  ;;  %v1316_v60 = vsel %vm1220_vm14, %v1295_v6, 0.0  ;;  %v1317_v27 = vsel %vm1221_vm12, %v1309_v34, 0.0  ;;  %v1475_v63 = vsel %vm906_vm10, %v4552_v3, %v1473_v13  ;;  %v4560_v44 = vld [vmem:[#allocation46_spill] sm:$0xff] }
 0x2cc   :  { %v1140_v18 = vadd.f32 %v1136_v20, %v956_v62  ;;  %v1321_v50 = vadd.f32 %v1317_v27, %v1141_v25  ;;  %v1485_v2 = vsel %vm900_vm8, %v4156_v17, %v4144_v37  ;;  %v1496_v8 = vsel %vm1400_vm15, %v1475_v63, 0.0  ;;  %v4565_v20 = vld [vmem:[#allocation51_spill] sm:$0xff]  ;;  %v4566_v63 = vld [vmem:[#allocation44_spill] sm:$0xff] }
 0x2cd   :  { %v1487_v28 = vsel %vm903_vm7, %v4176_v48, %v1485_v2  ;;  %v1655_v12 = vsel %vm906_vm10, %v4553_v35, %v1653_v55  ;;  %v4554_v56 = vmax.f32 %v4107_v14, 0.0  ;;  %vm2120_vm11 = vcmp.eq.s32.totalorder %v4555_v58, 1  ;;  %v4556_v14 = vld [vmem:[#allocation36_spill] sm:$0xff]  ;;  %v4567_v2 = vld [vmem:[#allocation45_spill] sm:$0xff] }
 0x2ce   :  { %v1320_v13 = vadd.f32 %v1316_v60, %v1140_v18  ;;  %v1489_v10 = vsel %vm906_vm10, %v1488_v61, %v1487_v28  ;;  %v1676_v37 = vsel %vm1580_vm5, %v1655_v12, 0.0  ;;  %v4557_v55 = vmax.f32 %v4556_v14, 0.0  ;;  %v4558_v61 = vld [vmem:[#allocation31_spill] sm:$0xff]  ;;  %v4571_v35 = vld [vmem:[#allocation53_spill] sm:$0xff] }
 0x2cf   :  { %v1663_v34 = vsel %vm897_vm6, %v4554_v56, %v4102_v9  ;;  %v1497_v48 = vsel %vm1401_vm0, %v1489_v10, 0.0  ;;  %v1842_v21 = vsel %vm894_vm3, %v4104_v46, %v4084_v11  ;;  %vm1941_vm13 = vcmp.eq.s32.totalorder %v4558_v61, 1 }
 0x2d0   :  { %v1665_v17 = vsel %vm900_vm8, %v4158_v7, %v1663_v34  ;;  %v1834_v9 = vrot.slane %v4557_v55, 6  ;;  %v1500_v19 = vadd.f32 %v1496_v8, %v1320_v13  ;;  %v1501_v7 = vadd.f32 %v1497_v48, %v1321_v50  ;;  %v4573_v34 = vld [vmem:[#allocation50_spill] sm:$0xff] }
 0x2d1   :  { %v1667_v0 = vsel %vm903_vm7, %v4178_v26, %v1665_v17  ;;  %v1844_v59 = vsel %vm897_vm6, %v4123_v30, %v1842_v21  ;;  %v4559_v49 = vmax.f32 %v4132_v4, 0.0  ;;  %v1917_v16 = vmax.f32 %v1885_v41, 0.0  ;;  %v4574_v17 = vld [vmem:[#allocation52_spill] sm:$0xff] }
 0x2d2   :  { %v1669_v40 = vsel %vm906_vm10, %v1668_v43, %v1667_v0  ;;  %v1835_v26 = vsel %vm906_vm10, %v1834_v9, %v1833_v53  ;;  %v1680_v11 = vadd.f32 %v1676_v37, %v1500_v19  ;;  %v1924_v39 = vmax.f32 %v4173_v33, 0.0  ;;  %v4561_v53 = vld [vmem:[#allocation47_spill] sm:$0xff]  ;;  %v4575_v0 = vld [vmem:[#allocation18_spill] sm:$0xff] }
 0x2d3   :  { %v1677_v5 = vsel %vm1581_vm9, %v1669_v40, 0.0  ;;  %v1845_v51 = vsel %vm900_vm8, %v4559_v49, %v1844_v59  ;;  %v1856_v43 = vsel %vm1760_vm4, %v1835_v26, 0.0  ;;  %v2014_v1 = vrot.slane %v1917_v16, 7 }
 0x2d4   :  { %v1681_v46 = vadd.f32 %v1677_v5, %v1501_v7  ;;  %v1847_v22 = vsel %vm903_vm7, %v4180_v29, %v1845_v51  ;;  %vm4562_vm9 = vcmask 1042434   ;;  %v1860_v25 = vadd.f32 %v1856_v43, %v1680_v11  ;;  %v4564_v29 = vld [vmem:[#allocation37_spill] sm:$0xff] }
 0x2d5   :  { %v1849_v30 = vsel %vm906_vm10, %v1848_v36, %v1847_v22  ;;  %v2020_v4 = vsel %vm4562_vm9, %v4561_v53, %v4560_v44  ;;  %v2072_v45 = vadd.f32 %v4564_v29, %v4114_v23  ;;  %v2015_v36 = vsel %vm906_vm10, %v2014_v1, %v2013_v42  ;;  %v4576_v5 = vld [vmem:[#allocation5_spill] sm:$0xff] }
 0x2d6   :  { %v1857_v41 = vsel %vm1761_vm1, %v1849_v30, 0.0  ;;  %v2022_v6 = vsel %vm894_vm3, %v4563_v47, %v2020_v4  ;;  %v2097_v60 = vmax.f32 %v4263_v15, 0.0  ;;  %v2036_v31 = vsel %vm1940_vm2, %v2015_v36, 0.0  ;;  %vm4570_vm2 = vmmov %vm4562_vm9 }
 0x2d7   :  { %v1861_v62 = vadd.f32 %v1857_v41, %v1681_v46  ;;  %v2024_v33 = vsel %vm897_vm6, %v4565_v20, %v2022_v6  ;;  %v2104_v18 = vmax.f32 %v2072_v45, 0.0  ;;  %v2105_v50 = vmax.f32 %v4222_v57, 0.0 }
 0x2d8   :  { %v2026_v27 = vsel %vm900_vm8, %v4160_v38, %v2024_v33  ;;  %v2040_v23 = vadd.f32 %v2036_v31, %v1860_v25  ;;  %v2194_v42 = vsel %vm903_vm7, %v2193_v24, %v4255_v32  ;;  %vm4568_vm12 = vcmask 1041409  }
 0x2d9   :  { %v2027_v3 = vsel %vm903_vm7, %v1924_v39, %v2026_v27  ;;  %v2198_v28 = vsel %vm4568_vm12, %v4567_v2, %v4566_v63  ;;  %v2195_v38 = vsel %vm906_vm10, %v2097_v60, %v2194_v42  ;;  %v4572_v57 = vmax.f32 %v4571_v35, 0.0 }
 0x2da   :  { %v2029_v15 = vsel %vm906_vm10, %v4244_v52, %v2027_v3  ;;  %v2200_v8 = vsel %vm4570_vm2, %v4569_v54, %v2198_v28  ;;  %v2207_v24 = vrot.slane %v2104_v18, 1  ;;  %v2216_v13 = vsel %vm2120_vm11, %v2195_v38, 0.0  ;;  %v2612_v52 = vld [vmem:[%s4395_s8] ss:$0 sm:$0xff]  ;;  %s2657_s8 = smov [#allocation2]  }
 0x2db   :  { %v2205_v12 = vrot.slane %v4572_v57, 2  ;;  %v2037_v56 = vsel %vm1941_vm13, %v2029_v15, 0.0  ;;  %v2202_v32 = vsel %vm894_vm3, %v4573_v34, %v2200_v8  ;;  %v2220_v48 = vadd.f32 %v2216_v13, %v2040_v23  ;;  %s2332_s18 = sshll.u32 %s2657_s8, 4  ;;  %s2333_s18 = int_to_ptr.vmem [resolvable:$true] %s2332_s18 }
 0x2dc   :  { %v2041_v10 = vadd.f32 %v2037_v56, %v1861_v62  ;;  %v2204_v37 = vsel %vm897_vm6, %v4574_v17, %v2202_v32  ;;  %vm2121_vm14 = vcmp.eq.s32.totalorder %v4575_v0, 1  ;;  %v2301_v9 = vpop.f32.mrf.mxu0  ;;  %vm2311_vm3 = vcmp.eq.s32.totalorder %v4576_v5, 16 }
 0x2dd   :  { %v2206_v14 = vsel %vm900_vm8, %v2205_v12, %v2204_v37  ;;  %v2302_v58 = vadd.f32 %v2612_v52, %v2301_v9 }
 0x2de   :  { %v2208_v55 = vsel %vm903_vm7, %v2207_v24, %v2206_v14 }
 0x2df   :  { %v2209_v21 = vsel %vm906_vm10, %v2105_v50, %v2208_v55  ;;  %v2312_v7 = vmul.f32 1.442695, %v2302_v58 }
 0x2e0   :  { %v2217_v61 = vsel %vm2121_vm14, %v2209_v21, 0.0 }
 0x2e1   :  { %v2221_v19 = vadd.f32 %v2217_v61, %v2041_v10  ;;  %2613 = vpow2.f32 %v2312_v7 }
 0x2e3   :  { %v2223_v40 = vpack.c.bf16 %v2221_v19, %v2220_v48 }
 0x2e4   :  { %v2303_v59 = vpop.f32.mrf.mxu0 }
 0x2e5   :  { %2305 = vmatmul.bf16.vlgmr.msra.gmra.mxu3 %v2223_v40  ;;  %v2304_v26 = vadd.f32 %v2612_v52, %v2303_v59 }
 0x2e7   :  { %v2614_v49 = vpop.eup %2613  ;;  %v2314_v51 = vmul.f32 1.442695, %v2304_v26 }
 0x2e8   :  { %v2320_v16 = vsel %vm2311_vm3, %v2614_v49, %v2302_v58 }
 0x2e9   :  { %2324 = vst [vmem:[#allocation2] sm:$0xff] %v2320_v16  ;;  %2615 = vpow2.f32 %v2314_v51 }
 0x2ef   :  { %v2616_v11 = vpop.eup %2615 }
 0x2f0   :  { %v2321_v46 = vsel %vm2311_vm3, %v2616_v11, %v2304_v26 }
 0x2f1   :  { %2325 = vst [vmem:[#allocation2 + $0x8] sm:$0xff] %v2321_v46 }
 0x368   :  { %v2306_v22 = vpop.f32.mrf.mxu3 }
 0x369   :  { %v2307_v43 = vadd.f32 %v2612_v52, %v2306_v22 }
 0x36b   :  { %v2316_v30 = vmul.f32 1.442695, %v2307_v43 }
 0x36d   :  { %2617 = vpow2.f32 %v2316_v30 }
 0x370   :  { %v2308_v39 = vpop.f32.mrf.mxu3 }
 0x371   :  { %v2309_v1 = vadd.f32 %v2612_v52, %v2308_v39 }
 0x373   :  { %v2618_v44 = vpop.eup %2617  ;;  %v2318_v53 = vmul.f32 1.442695, %v2309_v1 }
 0x374   :  { %v2322_v4 = vsel %vm2311_vm3, %v2618_v44, %v2307_v43 }
 0x375   :  { %2326 = vst [vmem:[#allocation2 + $0x10] sm:$0xff] %v2322_v4  ;;  %2619 = vpow2.f32 %v2318_v53 }
 0x37b   :  { %v2620_v41 = vpop.eup %2619 }
 0x37c   :  { %v2323_v25 = vsel %vm2311_vm3, %v2620_v41, %v2309_v1 }
 0x37d   :  { %2327 = vst [vmem:[#allocation2 + $0x18] sm:$0xff] %v2323_v25 }
 0x37e   :  { %2340 = dma.vmem_to_hbm [thread:$0]  %s2333_s18, 512, %s2335_s2, [#allocation3], %s2658_s21, %s2658_s21, %s2659_s22  }
 0x37f   :  { %2646 = dma.done.wait [#allocation3], 512  }
 0x380   :  { %2647 = vsyncadd [#allocation3], 4294966784 }
 0x381   :  { %2345 = vsyncpa [#allocation3], 1 }

</bundles_post_ra>
